<compile_context>
chip_gen: v5e
topology: v5e:2x2
jax: 0.10.0
libtpu: 0.0.40
codegen_flags: <defaults>
</compile_context>

<pallas_src>
import jax
import jax.numpy as jnp
from jax import lax
from jax.experimental import pallas as pl
from jax.experimental.pallas import tpu as pltpu

# Explicit scoped-VMEM limit: above v5e's 16 MiB / v6e's 32 MiB defaults,
# with headroom under v7x's 64 MiB physical VMEM.
_VMEM_LIMIT = 48 * 1024 * 1024


def _round_up(x, m):
    return (x + m - 1) // m * m


# ---------------------------------------------------------------------------
# (1) Fused input projection:  gi[t, g] = x[t] @ W_x[g] + ctx[g]
#     ctx already contains h0 @ W_c + b_ih + b_hh(r,z); output is emitted
#     directly in the gate-stacked bf16 layout the recurrence consumes.
# ---------------------------------------------------------------------------
def _input_proj_kernel(x_ref, wx_ref, ctx_ref, gi_ref):
    tc = x_ref.shape[0]
    w0, w1, w2 = wx_ref[0], wx_ref[1], wx_ref[2]          # (E, H) bf16
    c0, c1, c2 = ctx_ref[0], ctx_ref[1], ctx_ref[2]       # (B, H) f32
    for t in range(tc):                                   # small bounded unroll
        xt = x_ref[t]                                     # (B, E) bf16
        gi_ref[t, 0] = (jnp.dot(xt, w0, preferred_element_type=jnp.float32)
                        + c0).astype(gi_ref.dtype)
        gi_ref[t, 1] = (jnp.dot(xt, w1, preferred_element_type=jnp.float32)
                        + c1).astype(gi_ref.dtype)
        gi_ref[t, 2] = (jnp.dot(xt, w2, preferred_element_type=jnp.float32)
                        + c2).astype(gi_ref.dtype)


# ---------------------------------------------------------------------------
# (2) Sequential GRU recurrence, chunked over time (grid axis "arbitrary") and
#     split over batch (grid axis "parallel", uses both v7x TensorCores).
#     Hidden state carried in f32 VMEM scratch; MXU operands bf16; gate math
#     f32.  PyTorch nn.GRU gate order (r, z, n):
#         r  = sigmoid(gi_r + h W_hr)          (b_ir, b_hr folded into gi_r)
#         z  = sigmoid(gi_z + h W_hz)          (b_iz, b_hz folded into gi_z)
#         n  = tanh  (gi_n + r * (h W_hn + b_hn))
#         h' = (1 - z) * n + z * h
# ---------------------------------------------------------------------------
def _gru_recurrent_kernel(gi_ref, h0_ref, whh_ref, bhn_ref,
                          h_seq_ref, h_last_ref, h_scr):
    @pl.when(pl.program_id(1) == 0)
    def _():                                              # first time-chunk
        h_scr[...] = h0_ref[...]

    tc = gi_ref.shape[0]
    w_r, w_z, w_n = whh_ref[0], whh_ref[1], whh_ref[2]    # (H, H) bf16
    bhn = bhn_ref[...]                                    # (1, H) f32
    # TODO(synk): when H % 128 == 0, fuse the three dots into one
    # (B,H)@(H,3H) MXU push with lane-aligned gate slices (v6e/v7x micro-opt).

    def step(i, h):
        g = gi_ref[i]                                     # (3, B, H) bf16
        hb = h.astype(jnp.bfloat16)
        gh_r = jnp.dot(hb, w_r, preferred_element_type=jnp.float32)
        gh_z = jnp.dot(hb, w_z, preferred_element_type=jnp.float32)
        gh_n = jnp.dot(hb, w_n, preferred_element_type=jnp.float32)
        r = jax.nn.sigmoid(g[0].astype(jnp.float32) + gh_r)
        z = jax.nn.sigmoid(g[1].astype(jnp.float32) + gh_z)
        n = jnp.tanh(g[2].astype(jnp.float32) + r * (gh_n + bhn))
        h_new = (1.0 - z) * n + z * h
        h_seq_ref[i] = h_new.astype(h_seq_ref.dtype)
        return h_new

    h_fin = lax.fori_loop(0, tc, step, h_scr[...], unroll=True)
    h_scr[...] = h_fin
    h_last_ref[...] = h_fin                               # f32 final state


# ---------------------------------------------------------------------------
# (3) Weight-stationary GEMM + bias for the vocab projection.
#     N (vocab) tile axis is the OUTER grid axis so the (K, tn) weight block
#     index is constant over the inner row sweep -> W_out streamed once.
# ---------------------------------------------------------------------------
def _matmul_bias_kernel(a_ref, w_ref, b_ref, o_ref):
    o_ref[...] = (jnp.dot(a_ref[...].astype(jnp.bfloat16),
                          w_ref[...].astype(jnp.bfloat16),
                          preferred_element_type=jnp.float32)
                  + b_ref[...])


def _matmul_bias(a, w, b, *, tm=256):
    """out = a @ w + b;  a: (M, K), w: (K, N) with N a 128-multiple, b: (1, N)."""
    M, K = a.shape
    N = w.shape[1]
    assert N % 128 == 0, "pad N to a lane multiple outside the jitted function"
    tn = 512 if N % 512 == 0 else (256 if N % 256 == 0 else 128)
    tm = min(tm, _round_up(M, 8))
    Mp = _round_up(M, tm)
    a_p = a if Mp == M else jnp.pad(a, ((0, Mp - M), (0, 0)))

    out = pl.pallas_call(
        _matmul_bias_kernel,
        out_shape=jax.ShapeDtypeStruct((Mp, N), jnp.float32),
        grid_spec=pltpu.PrefetchScalarGridSpec(
            num_scalar_prefetch=0,
            grid=(N // tn, Mp // tm),                      # N outer, M inner
            in_specs=[
                pl.BlockSpec((tm, K), lambda j, i: (i, 0)),   # activations
                pl.BlockSpec((K, tn), lambda j, i: (0, j)),   # weight (stationary)
                pl.BlockSpec((1, tn), lambda j, i: (0, j)),   # bias
            ],
            out_specs=pl.BlockSpec((tm, tn), lambda j, i: (i, j)),
        ),
        compiler_params=pltpu.CompilerParams(
            dimension_semantics=("parallel", "parallel"),
            vmem_limit_bytes=_VMEM_LIMIT),
    )(a_p, w, b)
    return out[:M]


# ---------------------------------------------------------------------------
# Wrapper
# ---------------------------------------------------------------------------
def gru_seq2seq_decoder(tokens, state, params, *, vocab_size, t_chunk=4):
    """tokens: (B, T) int32; state: (1, B, H) f32; params from prepare_params.

    Returns (logits (B, T, vocab_size) f32, new_state (1, B, H) f32).
    """
    # Time-major embedding gather: transpose the tiny int32 index tensor, not
    # the gathered activations.
    # TODO(synk): could be fused into the input-projection kernel via
    # PrefetchScalarGridSpec + pl.Element row gather; kept as an XLA gather.
    x = params["embedding"][tokens.T]                     # (T, B, E) bf16
    T, B, E = x.shape
    h0 = state[-1]                                        # (B, H) f32
    H = h0.shape[-1]
    Vp = params["w_out"].shape[-1]

    tc = min(t_chunk, T)
    while T % tc:
        tc -= 1
    # v7x: batch-parallel grid axis uses both TensorCores for the recurrence
    # when the per-core slice stays sublane-aligned.
    n_bc = 2 if (B % 2 == 0 and (B // 2) % 8 == 0) else 1
    bc = B // n_bc

    # Encoder-context gate contribution + folded biases: identical every step,
    # computed once (tiny XLA matmul), gate-stacked to (3, B, H).  b_ih (all
    # gates) and b_hh for r/z fold here; b_hn stays inside r*(.) (PyTorch).
    b_hh = params["b_hh"]
    b_hh_rz = jnp.concatenate(
        [b_hh[:, :2 * H], jnp.zeros((1, H), jnp.float32)], axis=1)
    ctx = h0 @ params["w_c"] + params["b_ih"] + b_hh_rz            # (B, 3H)
    ctx_g = jnp.transpose(ctx.reshape(B, 3, H), (1, 0, 2))         # (3, B, H)
    b_hh_n = b_hh[:, 2 * H:]                                       # (1, H)

    # (1) Fused input projection -> gi (T, 3, B, H) bf16.
    gi = pl.pallas_call(
        _input_proj_kernel,
        out_shape=jax.ShapeDtypeStruct((T, 3, B, H), jnp.bfloat16),
        grid_spec=pltpu.PrefetchScalarGridSpec(
            num_scalar_prefetch=0,
            grid=(T // tc,),
            in_specs=[
                pl.BlockSpec((tc, B, E), lambda t: (t, 0, 0)),
                pl.BlockSpec((3, E, H), lambda t: (0, 0, 0)),
                pl.BlockSpec((3, B, H), lambda t: (0, 0, 0)),
            ],
            out_specs=pl.BlockSpec((tc, 3, B, H), lambda t: (t, 0, 0, 0)),
        ),
        compiler_params=pltpu.CompilerParams(
            dimension_semantics=("parallel",),
            vmem_limit_bytes=_VMEM_LIMIT),
    )(x, params["w_x"], ctx_g)

    # (2) Sequential recurrence, chunked over time, batch-parallel.
    h_seq, h_last = pl.pallas_call(
        _gru_recurrent_kernel,
        out_shape=(jax.ShapeDtypeStruct((T, B, H), jnp.bfloat16),
                   jax.ShapeDtypeStruct((B, H), jnp.float32)),
        grid_spec=pltpu.PrefetchScalarGridSpec(
            num_scalar_prefetch=0,
            grid=(n_bc, T // tc),                          # carry axis last
            in_specs=[
                pl.BlockSpec((tc, 3, bc, H), lambda b, t: (t, 0, b, 0)),
                pl.BlockSpec((bc, H), lambda b, t: (b, 0)),
                pl.BlockSpec((3, H, H), lambda b, t: (0, 0, 0)),
                pl.BlockSpec((1, H), lambda b, t: (0, 0)),
            ],
            out_specs=(pl.BlockSpec((tc, bc, H), lambda b, t: (t, b, 0)),
                       pl.BlockSpec((bc, H), lambda b, t: (b, 0))),
            scratch_shapes=[pltpu.VMEM((bc, H), jnp.float32)],
        ),
        compiler_params=pltpu.CompilerParams(
            dimension_semantics=("parallel", "arbitrary"),
            vmem_limit_bytes=_VMEM_LIMIT),
    )(gi, h0, params["w_hh"], b_hh_n)

    # (3) Vocab projection: transpose the CHEAP (T,B,H) tensor to batch-major
    #     (V/H x cheaper than transposing logits), then weight-stationary GEMM.
    h_bt = jnp.transpose(h_seq, (1, 0, 2)).reshape(B * T, H)
    logits = _matmul_bias(h_bt, params["w_out"], params["b_out"])   # (B*T, Vp)
    output = logits.reshape(B, T, Vp)[:, :, :vocab_size]
    # TODO(synk): production callers should keep the lane-padded Vp logits and
    # mask in the loss instead of slicing here.
    return output, h_last[None]


# ---------------------------------------------------------------------------
# Parameters: reference (f32, PyTorch layout) + offline kernel re-layout.
# ---------------------------------------------------------------------------
def init_params(key, vocab_size, embed_size, num_hiddens):
    ks = jax.random.split(key, 8)
    s = 0.1
    H = num_hiddens
    return {
        "embedding": s * jax.random.normal(ks[0], (vocab_size, embed_size), jnp.float32),
        # W_ih^T split into token part (E, 3H) and encoder-context part (H, 3H);
        # gate order along columns is (r, z, n) as in nn.GRU.
        "w_x": s * jax.random.normal(ks[1], (embed_size, 3 * H), jnp.float32),
        "w_c": s * jax.random.normal(ks[2], (H, 3 * H), jnp.float32),
        # W_hh^T stacked per gate: (3, H, H) = (W_hr^T, W_hz^T, W_hn^T).
        "w_hh": s * jax.random.normal(ks[3], (3, H, H), jnp.float32),
        "b_ih": s * jax.random.normal(ks[4], (1, 3 * H), jnp.float32),
        "b_hh": s * jax.random.normal(ks[5], (1, 3 * H), jnp.float32),
        "w_out": s * jax.random.normal(ks[6], (H, vocab_size), jnp.float32),
        "b_out": s * jax.random.normal(ks[7], (1, vocab_size), jnp.float32),
    }


def prepare_params(params):
    """One-time, OUTSIDE-jit re-layout: gate-stacking, bf16 casts, lane padding
    of the vocab projection (no per-call HBM padding/copies inside the jit)."""
    E, H3 = params["w_x"].shape
    H = H3 // 3
    V = params["w_out"].shape[1]
    Vp = _round_up(V, 128)
    w_out, b_out = params["w_out"], params["b_out"]
    if Vp != V:
        w_out = jnp.pad(w_out, ((0, 0), (0, Vp - V)))
        b_out = jnp.pad(b_out, ((0, 0), (0, Vp - V)))
    return {
        "embedding": params["embedding"].astype(jnp.bfloat16),
        "w_x": jnp.transpose(params["w_x"].reshape(E, 3, H),
                             (1, 0, 2)).astype(jnp.bfloat16),        # (3, E, H)
        "w_c": params["w_c"],                                        # f32
        "w_hh": params["w_hh"].astype(jnp.bfloat16),                 # (3, H, H)
        "b_ih": params["b_ih"],
        "b_hh": params["b_hh"],
        "w_out": w_out.astype(jnp.bfloat16),                         # (H, Vp)
        "b_out": b_out,                                              # (1, Vp)
    }


# ---------------------------------------------------------------------------
# Pure-JAX f32 reference (same math as torch: concat input, full GRU, Linear).
# ---------------------------------------------------------------------------
def _reference_decoder(tokens, state, params):
    emb = params["embedding"][tokens]
    x = jnp.transpose(emb, (1, 0, 2))
    T, B, _ = x.shape
    h0 = state[-1]
    H = h0.shape[-1]
    context = jnp.broadcast_to(h0[None], (T, B, H))
    xcat = jnp.concatenate([x, context], axis=-1)

    w_ih = jnp.concatenate([params["w_x"], params["w_c"]], axis=0)    # (E+H,3H)
    w_hh = jnp.concatenate([params["w_hh"][0], params["w_hh"][1],
                            params["w_hh"][2]], axis=1)               # (H, 3H)
    b_ih, b_hh = params["b_ih"], params["b_hh"]

    def step(h, xt):
        gi = xt @ w_ih + b_ih
        gh = h @ w_hh + b_hh
        r = jax.nn.sigmoid(gi[:, :H] + gh[:, :H])
        z = jax.nn.sigmoid(gi[:, H:2 * H] + gh[:, H:2 * H])
        n = jnp.tanh(gi[:, 2 * H:] + r * gh[:, 2 * H:])
        h_new = (1.0 - z) * n + z * h
        return h_new, h_new @ params["w_out"] + params["b_out"]

    hT, logits_tm = lax.scan(step, h0, xcat)
    return jnp.transpose(logits_tm, (1, 0, 2)), hT[None]


if __name__ == "__main__":
    VOCAB, EMBED, HIDDEN = 32, 16, 32
    BATCH, SEQ = 4, 8

    key = jax.random.PRNGKey(0)
    kp, kt, kh = jax.random.split(key, 3)
    params = init_params(kp, VOCAB, EMBED, HIDDEN)
    kparams = prepare_params(params)          # offline re-layout (outside jit)

    tokens = jax.random.randint(kt, (BATCH, SEQ), 0, VOCAB, dtype=jnp.int32)
    # init_state(enc_outputs): last encoder hidden state, (num_layers=1, B, H)
    state = 0.1 * jax.random.normal(kh, (1, BATCH, HIDDEN), jnp.float32)

    decode = jax.jit(gru_seq2seq_decoder,
                     static_argnames=("vocab_size", "t_chunk"))
    out, new_state = decode(tokens, state, kparams,
                            vocab_size=VOCAB, t_chunk=4)
    out = jax.block_until_ready(out)
    new_state = jax.block_until_ready(new_state)

    ref_out, ref_state = _reference_decoder(tokens, state, params)
    assert out.shape == (BATCH, SEQ, VOCAB)
    assert new_state.shape == (1, BATCH, HIDDEN)
    # bf16 MXU operands / bf16 intermediate storage vs. the f32 reference:
    # tolerances loosened accordingly (values here are O(0.1-1)).
    assert jnp.allclose(out, ref_out, atol=5e-2, rtol=5e-2)
    assert jnp.allclose(new_state, ref_state, atol=5e-2, rtol=5e-2)

    print("KERNEL_OK")
</pallas_src>

<mosaic_0001>
module attributes {stable_mosaic.version = 11 : i64} {
  func.func @_input_proj_kernel(%arg0: i32, %arg1: memref<4x4x16xbf16, #tpu.memory_space<vmem>>, %arg2: memref<3x16x32xbf16, #tpu.memory_space<vmem>>, %arg3: memref<3x4x32xf32, #tpu.memory_space<vmem>>, %arg4: memref<4x3x4x32xbf16, #tpu.memory_space<vmem>>) attributes {dimension_semantics = [#tpu.dimension_semantics<parallel>], iteration_bounds = array<i64: 2>, scalar_prefetch = 0 : i64, scratch_operands = 0 : i64, tpu.core_type = #tpu.core_type<tc>, window_params = [{transform_indices = @transform_0, window_bounds = array<i64: 4, 4, 16>}, {pipeline_mode = #tpu.pipeline_mode<synchronous>, transform_indices = @transform_1, window_bounds = array<i64: 3, 16, 32>}, {pipeline_mode = #tpu.pipeline_mode<synchronous>, transform_indices = @transform_2, window_bounds = array<i64: 3, 4, 32>}, {transform_indices = @transform_3, window_bounds = array<i64: 4, 3, 4, 32>}]} {
    %c0 = arith.constant 0 : index
    %c0_0 = arith.constant 0 : index
    %c0_1 = arith.constant 0 : index
    %0 = vector.load %arg2[%c0, %c0_0, %c0_1] : memref<3x16x32xbf16, #tpu.memory_space<vmem>>, vector<1x16x32xbf16>
    %1 = vector.shape_cast %0 : vector<1x16x32xbf16> to vector<16x32xbf16>
    %c1 = arith.constant 1 : index
    %c0_2 = arith.constant 0 : index
    %c0_3 = arith.constant 0 : index
    %2 = vector.load %arg2[%c1, %c0_2, %c0_3] : memref<3x16x32xbf16, #tpu.memory_space<vmem>>, vector<1x16x32xbf16>
    %3 = vector.shape_cast %2 : vector<1x16x32xbf16> to vector<16x32xbf16>
    %c2 = arith.constant 2 : index
    %c0_4 = arith.constant 0 : index
    %c0_5 = arith.constant 0 : index
    %4 = vector.load %arg2[%c2, %c0_4, %c0_5] : memref<3x16x32xbf16, #tpu.memory_space<vmem>>, vector<1x16x32xbf16>
    %5 = vector.shape_cast %4 : vector<1x16x32xbf16> to vector<16x32xbf16>
    %c0_6 = arith.constant 0 : index
    %c0_7 = arith.constant 0 : index
    %c0_8 = arith.constant 0 : index
    %6 = vector.load %arg3[%c0_6, %c0_7, %c0_8] : memref<3x4x32xf32, #tpu.memory_space<vmem>>, vector<1x4x32xf32>
    %7 = vector.shape_cast %6 : vector<1x4x32xf32> to vector<4x32xf32>
    %c1_9 = arith.constant 1 : index
    %c0_10 = arith.constant 0 : index
    %c0_11 = arith.constant 0 : index
    %8 = vector.load %arg3[%c1_9, %c0_10, %c0_11] : memref<3x4x32xf32, #tpu.memory_space<vmem>>, vector<1x4x32xf32>
    %9 = vector.shape_cast %8 : vector<1x4x32xf32> to vector<4x32xf32>
    %c2_12 = arith.constant 2 : index
    %c0_13 = arith.constant 0 : index
    %c0_14 = arith.constant 0 : index
    %10 = vector.load %arg3[%c2_12, %c0_13, %c0_14] : memref<3x4x32xf32, #tpu.memory_space<vmem>>, vector<1x4x32xf32>
    %11 = vector.shape_cast %10 : vector<1x4x32xf32> to vector<4x32xf32>
    %c0_15 = arith.constant 0 : index
    %c0_16 = arith.constant 0 : index
    %c0_17 = arith.constant 0 : index
    %12 = vector.load %arg1[%c0_15, %c0_16, %c0_17] : memref<4x4x16xbf16, #tpu.memory_space<vmem>>, vector<1x4x16xbf16>
    %13 = vector.shape_cast %12 : vector<1x4x16xbf16> to vector<4x16xbf16>
    %cst = arith.constant dense<0.000000e+00> : vector<4x32xf32>
    %14 = tpu.matmul %13, %1, %cst {dimension_numbers = #tpu.dot_dimension_numbers<[1], [0], [0], [1], [0, 0, 1, 1], [], []>} : vector<4x16xbf16>, vector<16x32xbf16>, vector<4x32xf32> -> vector<4x32xf32>
    %15 = arith.addf %14, %7 : vector<4x32xf32>
    %16 = arith.truncf %15 : vector<4x32xf32> to vector<4x32xbf16>
    %c0_18 = arith.constant 0 : index
    %c0_19 = arith.constant 0 : index
    %c0_20 = arith.constant 0 : index
    %c0_21 = arith.constant 0 : index
    %17 = vector.load %arg4[%c0_18, %c0_19, %c0_20, %c0_21] : memref<4x3x4x32xbf16, #tpu.memory_space<vmem>>, vector<1x1x4x32xbf16>
    %18 = vector.shape_cast %17 : vector<1x1x4x32xbf16> to vector<4x32xbf16>
    %19 = vector.shape_cast %16 : vector<4x32xbf16> to vector<1x1x4x32xbf16>
    tpu.vector_store %arg4[%c0_18, %c0_19, %c0_20, %c0_21], %19 {strides = array<i32>} : memref<4x3x4x32xbf16, #tpu.memory_space<vmem>>, vector<1x1x4x32xbf16>,
    %cst_22 = arith.constant dense<0.000000e+00> : vector<4x32xf32>
    %20 = tpu.matmul %13, %3, %cst_22 {dimension_numbers = #tpu.dot_dimension_numbers<[1], [0], [0], [1], [0, 0, 1, 1], [], []>} : vector<4x16xbf16>, vector<16x32xbf16>, vector<4x32xf32> -> vector<4x32xf32>
    %21 = arith.addf %20, %9 : vector<4x32xf32>
    %22 = arith.truncf %21 : vector<4x32xf32> to vector<4x32xbf16>
    %c0_23 = arith.constant 0 : index
    %c1_24 = arith.constant 1 : index
    %c0_25 = arith.constant 0 : index
    %c0_26 = arith.constant 0 : index
    %23 = vector.load %arg4[%c0_23, %c1_24, %c0_25, %c0_26] : memref<4x3x4x32xbf16, #tpu.memory_space<vmem>>, vector<1x1x4x32xbf16>
    %24 = vector.shape_cast %23 : vector<1x1x4x32xbf16> to vector<4x32xbf16>
    %25 = vector.shape_cast %22 : vector<4x32xbf16> to vector<1x1x4x32xbf16>
    tpu.vector_store %arg4[%c0_23, %c1_24, %c0_25, %c0_26], %25 {strides = array<i32>} : memref<4x3x4x32xbf16, #tpu.memory_space<vmem>>, vector<1x1x4x32xbf16>,
    %cst_27 = arith.constant dense<0.000000e+00> : vector<4x32xf32>
    %26 = tpu.matmul %13, %5, %cst_27 {dimension_numbers = #tpu.dot_dimension_numbers<[1], [0], [0], [1], [0, 0, 1, 1], [], []>} : vector<4x16xbf16>, vector<16x32xbf16>, vector<4x32xf32> -> vector<4x32xf32>
    %27 = arith.addf %26, %11 : vector<4x32xf32>
    %28 = arith.truncf %27 : vector<4x32xf32> to vector<4x32xbf16>
    %c0_28 = arith.constant 0 : index
    %c2_29 = arith.constant 2 : index
    %c0_30 = arith.constant 0 : index
    %c0_31 = arith.constant 0 : index
    %29 = vector.load %arg4[%c0_28, %c2_29, %c0_30, %c0_31] : memref<4x3x4x32xbf16, #tpu.memory_space<vmem>>, vector<1x1x4x32xbf16>
    %30 = vector.shape_cast %29 : vector<1x1x4x32xbf16> to vector<4x32xbf16>
    %31 = vector.shape_cast %28 : vector<4x32xbf16> to vector<1x1x4x32xbf16>
    tpu.vector_store %arg4[%c0_28, %c2_29, %c0_30, %c0_31], %31 {strides = array<i32>} : memref<4x3x4x32xbf16, #tpu.memory_space<vmem>>, vector<1x1x4x32xbf16>,
    %c1_32 = arith.constant 1 : index
    %c0_33 = arith.constant 0 : index
    %c0_34 = arith.constant 0 : index
    %32 = vector.load %arg1[%c1_32, %c0_33, %c0_34] : memref<4x4x16xbf16, #tpu.memory_space<vmem>>, vector<1x4x16xbf16>
    %33 = vector.shape_cast %32 : vector<1x4x16xbf16> to vector<4x16xbf16>
    %cst_35 = arith.constant dense<0.000000e+00> : vector<4x32xf32>
    %34 = tpu.matmul %33, %1, %cst_35 {dimension_numbers = #tpu.dot_dimension_numbers<[1], [0], [0], [1], [0, 0, 1, 1], [], []>} : vector<4x16xbf16>, vector<16x32xbf16>, vector<4x32xf32> -> vector<4x32xf32>
    %35 = arith.addf %34, %7 : vector<4x32xf32>
    %36 = arith.truncf %35 : vector<4x32xf32> to vector<4x32xbf16>
    %c1_36 = arith.constant 1 : index
    %c0_37 = arith.constant 0 : index
    %c0_38 = arith.constant 0 : index
    %c0_39 = arith.constant 0 : index
    %37 = vector.load %arg4[%c1_36, %c0_37, %c0_38, %c0_39] : memref<4x3x4x32xbf16, #tpu.memory_space<vmem>>, vector<1x1x4x32xbf16>
    %38 = vector.shape_cast %37 : vector<1x1x4x32xbf16> to vector<4x32xbf16>
    %39 = vector.shape_cast %36 : vector<4x32xbf16> to vector<1x1x4x32xbf16>
    tpu.vector_store %arg4[%c1_36, %c0_37, %c0_38, %c0_39], %39 {strides = array<i32>} : memref<4x3x4x32xbf16, #tpu.memory_space<vmem>>, vector<1x1x4x32xbf16>,
    %cst_40 = arith.constant dense<0.000000e+00> : vector<4x32xf32>
    %40 = tpu.matmul %33, %3, %cst_40 {dimension_numbers = #tpu.dot_dimension_numbers<[1], [0], [0], [1], [0, 0, 1, 1], [], []>} : vector<4x16xbf16>, vector<16x32xbf16>, vector<4x32xf32> -> vector<4x32xf32>
    %41 = arith.addf %40, %9 : vector<4x32xf32>
    %42 = arith.truncf %41 : vector<4x32xf32> to vector<4x32xbf16>
    %c1_41 = arith.constant 1 : index
    %c1_42 = arith.constant 1 : index
    %c0_43 = arith.constant 0 : index
    %c0_44 = arith.constant 0 : index
    %43 = vector.load %arg4[%c1_41, %c1_42, %c0_43, %c0_44] : memref<4x3x4x32xbf16, #tpu.memory_space<vmem>>, vector<1x1x4x32xbf16>
    %44 = vector.shape_cast %43 : vector<1x1x4x32xbf16> to vector<4x32xbf16>
    %45 = vector.shape_cast %42 : vector<4x32xbf16> to vector<1x1x4x32xbf16>
    tpu.vector_store %arg4[%c1_41, %c1_42, %c0_43, %c0_44], %45 {strides = array<i32>} : memref<4x3x4x32xbf16, #tpu.memory_space<vmem>>, vector<1x1x4x32xbf16>,
    %cst_45 = arith.constant dense<0.000000e+00> : vector<4x32xf32>
    %46 = tpu.matmul %33, %5, %cst_45 {dimension_numbers = #tpu.dot_dimension_numbers<[1], [0], [0], [1], [0, 0, 1, 1], [], []>} : vector<4x16xbf16>, vector<16x32xbf16>, vector<4x32xf32> -> vector<4x32xf32>
    %47 = arith.addf %46, %11 : vector<4x32xf32>
    %48 = arith.truncf %47 : vector<4x32xf32> to vector<4x32xbf16>
    %c1_46 = arith.constant 1 : index
    %c2_47 = arith.constant 2 : index
    %c0_48 = arith.constant 0 : index
    %c0_49 = arith.constant 0 : index
    %49 = vector.load %arg4[%c1_46, %c2_47, %c0_48, %c0_49] : memref<4x3x4x32xbf16, #tpu.memory_space<vmem>>, vector<1x1x4x32xbf16>
    %50 = vector.shape_cast %49 : vector<1x1x4x32xbf16> to vector<4x32xbf16>
    %51 = vector.shape_cast %48 : vector<4x32xbf16> to vector<1x1x4x32xbf16>
    tpu.vector_store %arg4[%c1_46, %c2_47, %c0_48, %c0_49], %51 {strides = array<i32>} : memref<4x3x4x32xbf16, #tpu.memory_space<vmem>>, vector<1x1x4x32xbf16>,
    %c2_50 = arith.constant 2 : index
    %c0_51 = arith.constant 0 : index
    %c0_52 = arith.constant 0 : index
    %52 = vector.load %arg1[%c2_50, %c0_51, %c0_52] : memref<4x4x16xbf16, #tpu.memory_space<vmem>>, vector<1x4x16xbf16>
    %53 = vector.shape_cast %52 : vector<1x4x16xbf16> to vector<4x16xbf16>
    %cst_53 = arith.constant dense<0.000000e+00> : vector<4x32xf32>
    %54 = tpu.matmul %53, %1, %cst_53 {dimension_numbers = #tpu.dot_dimension_numbers<[1], [0], [0], [1], [0, 0, 1, 1], [], []>} : vector<4x16xbf16>, vector<16x32xbf16>, vector<4x32xf32> -> vector<4x32xf32>
    %55 = arith.addf %54, %7 : vector<4x32xf32>
    %56 = arith.truncf %55 : vector<4x32xf32> to vector<4x32xbf16>
    %c2_54 = arith.constant 2 : index
    %c0_55 = arith.constant 0 : index
    %c0_56 = arith.constant 0 : index
    %c0_57 = arith.constant 0 : index
    %57 = vector.load %arg4[%c2_54, %c0_55, %c0_56, %c0_57] : memref<4x3x4x32xbf16, #tpu.memory_space<vmem>>, vector<1x1x4x32xbf16>
    %58 = vector.shape_cast %57 : vector<1x1x4x32xbf16> to vector<4x32xbf16>
    %59 = vector.shape_cast %56 : vector<4x32xbf16> to vector<1x1x4x32xbf16>
    tpu.vector_store %arg4[%c2_54, %c0_55, %c0_56, %c0_57], %59 {strides = array<i32>} : memref<4x3x4x32xbf16, #tpu.memory_space<vmem>>, vector<1x1x4x32xbf16>,
    %cst_58 = arith.constant dense<0.000000e+00> : vector<4x32xf32>
    %60 = tpu.matmul %53, %3, %cst_58 {dimension_numbers = #tpu.dot_dimension_numbers<[1], [0], [0], [1], [0, 0, 1, 1], [], []>} : vector<4x16xbf16>, vector<16x32xbf16>, vector<4x32xf32> -> vector<4x32xf32>
    %61 = arith.addf %60, %9 : vector<4x32xf32>
    %62 = arith.truncf %61 : vector<4x32xf32> to vector<4x32xbf16>
    %c2_59 = arith.constant 2 : index
    %c1_60 = arith.constant 1 : index
    %c0_61 = arith.constant 0 : index
    %c0_62 = arith.constant 0 : index
    %63 = vector.load %arg4[%c2_59, %c1_60, %c0_61, %c0_62] : memref<4x3x4x32xbf16, #tpu.memory_space<vmem>>, vector<1x1x4x32xbf16>
    %64 = vector.shape_cast %63 : vector<1x1x4x32xbf16> to vector<4x32xbf16>
    %65 = vector.shape_cast %62 : vector<4x32xbf16> to vector<1x1x4x32xbf16>
    tpu.vector_store %arg4[%c2_59, %c1_60, %c0_61, %c0_62], %65 {strides = array<i32>} : memref<4x3x4x32xbf16, #tpu.memory_space<vmem>>, vector<1x1x4x32xbf16>,
    %cst_63 = arith.constant dense<0.000000e+00> : vector<4x32xf32>
    %66 = tpu.matmul %53, %5, %cst_63 {dimension_numbers = #tpu.dot_dimension_numbers<[1], [0], [0], [1], [0, 0, 1, 1], [], []>} : vector<4x16xbf16>, vector<16x32xbf16>, vector<4x32xf32> -> vector<4x32xf32>
    %67 = arith.addf %66, %11 : vector<4x32xf32>
    %68 = arith.truncf %67 : vector<4x32xf32> to vector<4x32xbf16>
    %c2_64 = arith.constant 2 : index
    %c2_65 = arith.constant 2 : index
    %c0_66 = arith.constant 0 : index
    %c0_67 = arith.constant 0 : index
    %69 = vector.load %arg4[%c2_64, %c2_65, %c0_66, %c0_67] : memref<4x3x4x32xbf16, #tpu.memory_space<vmem>>, vector<1x1x4x32xbf16>
    %70 = vector.shape_cast %69 : vector<1x1x4x32xbf16> to vector<4x32xbf16>
    %71 = vector.shape_cast %68 : vector<4x32xbf16> to vector<1x1x4x32xbf16>
    tpu.vector_store %arg4[%c2_64, %c2_65, %c0_66, %c0_67], %71 {strides = array<i32>} : memref<4x3x4x32xbf16, #tpu.memory_space<vmem>>, vector<1x1x4x32xbf16>,
    %c3 = arith.constant 3 : index
    %c0_68 = arith.constant 0 : index
    %c0_69 = arith.constant 0 : index
    %72 = vector.load %arg1[%c3, %c0_68, %c0_69] : memref<4x4x16xbf16, #tpu.memory_space<vmem>>, vector<1x4x16xbf16>
    %73 = vector.shape_cast %72 : vector<1x4x16xbf16> to vector<4x16xbf16>
    %cst_70 = arith.constant dense<0.000000e+00> : vector<4x32xf32>
    %74 = tpu.matmul %73, %1, %cst_70 {dimension_numbers = #tpu.dot_dimension_numbers<[1], [0], [0], [1], [0, 0, 1, 1], [], []>} : vector<4x16xbf16>, vector<16x32xbf16>, vector<4x32xf32> -> vector<4x32xf32>
    %75 = arith.addf %74, %7 : vector<4x32xf32>
    %76 = arith.truncf %75 : vector<4x32xf32> to vector<4x32xbf16>
    %c3_71 = arith.constant 3 : index
    %c0_72 = arith.constant 0 : index
    %c0_73 = arith.constant 0 : index
    %c0_74 = arith.constant 0 : index
    %77 = vector.load %arg4[%c3_71, %c0_72, %c0_73, %c0_74] : memref<4x3x4x32xbf16, #tpu.memory_space<vmem>>, vector<1x1x4x32xbf16>
    %78 = vector.shape_cast %77 : vector<1x1x4x32xbf16> to vector<4x32xbf16>
    %79 = vector.shape_cast %76 : vector<4x32xbf16> to vector<1x1x4x32xbf16>
    tpu.vector_store %arg4[%c3_71, %c0_72, %c0_73, %c0_74], %79 {strides = array<i32>} : memref<4x3x4x32xbf16, #tpu.memory_space<vmem>>, vector<1x1x4x32xbf16>,
    %cst_75 = arith.constant dense<0.000000e+00> : vector<4x32xf32>
    %80 = tpu.matmul %73, %3, %cst_75 {dimension_numbers = #tpu.dot_dimension_numbers<[1], [0], [0], [1], [0, 0, 1, 1], [], []>} : vector<4x16xbf16>, vector<16x32xbf16>, vector<4x32xf32> -> vector<4x32xf32>
    %81 = arith.addf %80, %9 : vector<4x32xf32>
    %82 = arith.truncf %81 : vector<4x32xf32> to vector<4x32xbf16>
    %c3_76 = arith.constant 3 : index
    %c1_77 = arith.constant 1 : index
    %c0_78 = arith.constant 0 : index
    %c0_79 = arith.constant 0 : index
    %83 = vector.load %arg4[%c3_76, %c1_77, %c0_78, %c0_79] : memref<4x3x4x32xbf16, #tpu.memory_space<vmem>>, vector<1x1x4x32xbf16>
    %84 = vector.shape_cast %83 : vector<1x1x4x32xbf16> to vector<4x32xbf16>
    %85 = vector.shape_cast %82 : vector<4x32xbf16> to vector<1x1x4x32xbf16>
    tpu.vector_store %arg4[%c3_76, %c1_77, %c0_78, %c0_79], %85 {strides = array<i32>} : memref<4x3x4x32xbf16, #tpu.memory_space<vmem>>, vector<1x1x4x32xbf16>,
    %cst_80 = arith.constant dense<0.000000e+00> : vector<4x32xf32>
    %86 = tpu.matmul %73, %5, %cst_80 {dimension_numbers = #tpu.dot_dimension_numbers<[1], [0], [0], [1], [0, 0, 1, 1], [], []>} : vector<4x16xbf16>, vector<16x32xbf16>, vector<4x32xf32> -> vector<4x32xf32>
    %87 = arith.addf %86, %11 : vector<4x32xf32>
    %88 = arith.truncf %87 : vector<4x32xf32> to vector<4x32xbf16>
    %c3_81 = arith.constant 3 : index
    %c2_82 = arith.constant 2 : index
    %c0_83 = arith.constant 0 : index
    %c0_84 = arith.constant 0 : index
    %89 = vector.load %arg4[%c3_81, %c2_82, %c0_83, %c0_84] : memref<4x3x4x32xbf16, #tpu.memory_space<vmem>>, vector<1x1x4x32xbf16>
    %90 = vector.shape_cast %89 : vector<1x1x4x32xbf16> to vector<4x32xbf16>
    %91 = vector.shape_cast %88 : vector<4x32xbf16> to vector<1x1x4x32xbf16>
    tpu.vector_store %arg4[%c3_81, %c2_82, %c0_83, %c0_84], %91 {strides = array<i32>} : memref<4x3x4x32xbf16, #tpu.memory_space<vmem>>, vector<1x1x4x32xbf16>,
    return
  }
  func.func @transform_0(%arg0: i32) -> (i32, i32, i32) {
    %c0_i32 = arith.constant 0 : i32
    %c0_i32_0 = arith.constant 0 : i32
    %c0_i32_1 = arith.constant 0 : i32
    return %arg0, %c0_i32, %c0_i32_0 : i32, i32, i32
  }
  func.func @transform_1(%arg0: i32) -> (i32, i32, i32) {
    %c0_i32 = arith.constant 0 : i32
    %c0_i32_0 = arith.constant 0 : i32
    %c0_i32_1 = arith.constant 0 : i32
    %c0_i32_2 = arith.constant 0 : i32
    return %c0_i32, %c0_i32_0, %c0_i32_1 : i32, i32, i32
  }
  func.func @transform_2(%arg0: i32) -> (i32, i32, i32) {
    %c0_i32 = arith.constant 0 : i32
    %c0_i32_0 = arith.constant 0 : i32
    %c0_i32_1 = arith.constant 0 : i32
    %c0_i32_2 = arith.constant 0 : i32
    return %c0_i32, %c0_i32_0, %c0_i32_1 : i32, i32, i32
  }
  func.func @transform_3(%arg0: i32) -> (i32, i32, i32, i32) {
    %c0_i32 = arith.constant 0 : i32
    %c0_i32_0 = arith.constant 0 : i32
    %c0_i32_1 = arith.constant 0 : i32
    %c0_i32_2 = arith.constant 0 : i32
    return %arg0, %c0_i32, %c0_i32_0, %c0_i32_1 : i32, i32, i32, i32
  }
}

module attributes {stable_mosaic.version = 11 : i64} {
  func.func @_matmul_bias_kernel(%arg0: i32, %arg1: i32, %arg2: memref<32x32xbf16, #tpu.memory_space<vmem>>, %arg3: memref<32x128xbf16, #tpu.memory_space<vmem>>, %arg4: memref<1x128xf32, #tpu.memory_space<vmem>>, %arg5: memref<32x128xf32, #tpu.memory_space<vmem>>) attributes {dimension_semantics = [#tpu.dimension_semantics<parallel>, #tpu.dimension_semantics<parallel>], iteration_bounds = array<i64: 1, 1>, scalar_prefetch = 0 : i64, scratch_operands = 0 : i64, tpu.core_type = #tpu.core_type<tc>, window_params = [{transform_indices = @transform_0, window_bounds = array<i64: 32, 32>}, {transform_indices = @transform_1, window_bounds = array<i64: 32, 128>}, {transform_indices = @transform_2, window_bounds = array<i64: 1, 128>}, {transform_indices = @transform_3, window_bounds = array<i64: 32, 128>}]} {
    %c0 = arith.constant 0 : index
    %c0_0 = arith.constant 0 : index
    %0 = vector.load %arg2[%c0, %c0_0] : memref<32x32xbf16, #tpu.memory_space<vmem>>, vector<32x32xbf16>
    %c0_1 = arith.constant 0 : index
    %c0_2 = arith.constant 0 : index
    %1 = vector.load %arg3[%c0_1, %c0_2] : memref<32x128xbf16, #tpu.memory_space<vmem>>, vector<32x128xbf16>
    %cst = arith.constant dense<0.000000e+00> : vector<32x128xf32>
    %2 = tpu.matmul %0, %1, %cst {dimension_numbers = #tpu.dot_dimension_numbers<[1], [0], [0], [1], [0, 0, 1, 1], [], []>} : vector<32x32xbf16>, vector<32x128xbf16>, vector<32x128xf32> -> vector<32x128xf32>
    %c0_3 = arith.constant 0 : index
    %c0_4 = arith.constant 0 : index
    %3 = vector.load %arg4[%c0_3, %c0_4] : memref<1x128xf32, #tpu.memory_space<vmem>>, vector<1x128xf32>
    %4 = vector.broadcast %3 : vector<1x128xf32> to vector<32x128xf32>
    %5 = arith.addf %2, %4 : vector<32x128xf32>
    %c0_5 = arith.constant 0 : index
    %c0_6 = arith.constant 0 : index
    %6 = vector.load %arg5[%c0_5, %c0_6] : memref<32x128xf32, #tpu.memory_space<vmem>>, vector<32x128xf32>
    tpu.vector_store %arg5[%c0_5, %c0_6], %5 {strides = array<i32>} : memref<32x128xf32, #tpu.memory_space<vmem>>, vector<32x128xf32>,
    return
  }
  func.func @transform_0(%arg0: i32, %arg1: i32) -> (i32, i32) {
    %c0_i32 = arith.constant 0 : i32
    %c0_i32_0 = arith.constant 0 : i32
    return %arg1, %c0_i32 : i32, i32
  }
  func.func @transform_1(%arg0: i32, %arg1: i32) -> (i32, i32) {
    %c0_i32 = arith.constant 0 : i32
    %c0_i32_0 = arith.constant 0 : i32
    return %c0_i32, %arg0 : i32, i32
  }
  func.func @transform_2(%arg0: i32, %arg1: i32) -> (i32, i32) {
    %c0_i32 = arith.constant 0 : i32
    %c0_i32_0 = arith.constant 0 : i32
    return %c0_i32, %arg0 : i32, i32
  }
  func.func @transform_3(%arg0: i32, %arg1: i32) -> (i32, i32) {
    %c0_i32 = arith.constant 0 : i32
    return %arg1, %arg0 : i32, i32
  }
}

module attributes {stable_mosaic.version = 11 : i64} {
  func.func @_gru_recurrent_kernel(%arg0: i32, %arg1: i32, %arg2: memref<4x3x4x32xbf16, #tpu.memory_space<vmem>>, %arg3: memref<4x32xf32, #tpu.memory_space<vmem>>, %arg4: memref<3x32x32xbf16, #tpu.memory_space<vmem>>, %arg5: memref<1x32xf32, #tpu.memory_space<vmem>>, %arg6: memref<4x4x32xbf16, #tpu.memory_space<vmem>>, %arg7: memref<4x32xf32, #tpu.memory_space<vmem>>, %arg8: memref<4x32xf32, #tpu.memory_space<vmem>>) attributes {dimension_semantics = [#tpu.dimension_semantics<parallel>, #tpu.dimension_semantics<arbitrary>], iteration_bounds = array<i64: 1, 2>, scalar_prefetch = 0 : i64, scratch_operands = 1 : i64, tpu.core_type = #tpu.core_type<tc>, window_params = [{transform_indices = @transform_0, window_bounds = array<i64: 4, 3, 4, 32>}, {transform_indices = @transform_1, window_bounds = array<i64: 4, 32>}, {pipeline_mode = #tpu.pipeline_mode<synchronous>, transform_indices = @transform_2, window_bounds = array<i64: 3, 32, 32>}, {pipeline_mode = #tpu.pipeline_mode<synchronous>, transform_indices = @transform_3, window_bounds = array<i64: 1, 32>}, {transform_indices = @transform_4, window_bounds = array<i64: 4, 4, 32>}, {transform_indices = @transform_5, window_bounds = array<i64: 4, 32>}]} {
    %c0_i32 = arith.constant 0 : i32
    %0 = arith.cmpi eq, %arg1, %c0_i32 : i32
    %1 = arith.extui %0 : i1 to i32
    %c0_i32_0 = arith.constant 0 : i32
    %2 = arith.cmpi ne, %1, %c0_i32_0 : i32
    scf.if %2 {
      %c0_59 = arith.constant 0 : index
      %c0_60 = arith.constant 0 : index
      %185 = vector.load %arg3[%c0_59, %c0_60] : memref<4x32xf32, #tpu.memory_space<vmem>>, vector<4x32xf32>
      %c0_61 = arith.constant 0 : index
      %c0_62 = arith.constant 0 : index
      %186 = vector.load %arg8[%c0_61, %c0_62] : memref<4x32xf32, #tpu.memory_space<vmem>>, vector<4x32xf32>
      tpu.vector_store %arg8[%c0_61, %c0_62], %185 {strides = array<i32>} : memref<4x32xf32, #tpu.memory_space<vmem>>, vector<4x32xf32>,
    } else {
    }
    %c0 = arith.constant 0 : index
    %c0_1 = arith.constant 0 : index
    %c0_2 = arith.constant 0 : index
    %3 = vector.load %arg4[%c0, %c0_1, %c0_2] : memref<3x32x32xbf16, #tpu.memory_space<vmem>>, vector<1x32x32xbf16>
    %4 = vector.shape_cast %3 : vector<1x32x32xbf16> to vector<32x32xbf16>
    %c1 = arith.constant 1 : index
    %c0_3 = arith.constant 0 : index
    %c0_4 = arith.constant 0 : index
    %5 = vector.load %arg4[%c1, %c0_3, %c0_4] : memref<3x32x32xbf16, #tpu.memory_space<vmem>>, vector<1x32x32xbf16>
    %6 = vector.shape_cast %5 : vector<1x32x32xbf16> to vector<32x32xbf16>
    %c2 = arith.constant 2 : index
    %c0_5 = arith.constant 0 : index
    %c0_6 = arith.constant 0 : index
    %7 = vector.load %arg4[%c2, %c0_5, %c0_6] : memref<3x32x32xbf16, #tpu.memory_space<vmem>>, vector<1x32x32xbf16>
    %8 = vector.shape_cast %7 : vector<1x32x32xbf16> to vector<32x32xbf16>
    %c0_7 = arith.constant 0 : index
    %c0_8 = arith.constant 0 : index
    %9 = vector.load %arg5[%c0_7, %c0_8] : memref<1x32xf32, #tpu.memory_space<vmem>>, vector<1x32xf32>
    %c0_9 = arith.constant 0 : index
    %c0_10 = arith.constant 0 : index
    %10 = vector.load %arg8[%c0_9, %c0_10] : memref<4x32xf32, #tpu.memory_space<vmem>>, vector<4x32xf32>
    %c0_i32_11 = arith.constant 0 : i32
    %11 = arith.index_cast %c0_i32_11 : i32 to index
    %c0_12 = arith.constant 0 : index
    %c0_13 = arith.constant 0 : index
    %c0_14 = arith.constant 0 : index
    %12 = vector.load %arg2[%11, %c0_12, %c0_13, %c0_14] : memref<4x3x4x32xbf16, #tpu.memory_space<vmem>>, vector<1x3x4x32xbf16>
    %13 = vector.shape_cast %12 : vector<1x3x4x32xbf16> to vector<3x4x32xbf16>
    %14 = arith.truncf %10 : vector<4x32xf32> to vector<4x32xbf16>
    %cst = arith.constant dense<0.000000e+00> : vector<4x32xf32>
    %15 = tpu.matmul %14, %4, %cst {dimension_numbers = #tpu.dot_dimension_numbers<[1], [0], [0], [1], [0, 0, 1, 1], [], []>} : vector<4x32xbf16>, vector<32x32xbf16>, vector<4x32xf32> -> vector<4x32xf32>
    %cst_15 = arith.constant dense<0.000000e+00> : vector<4x32xf32>
    %16 = tpu.matmul %14, %6, %cst_15 {dimension_numbers = #tpu.dot_dimension_numbers<[1], [0], [0], [1], [0, 0, 1, 1], [], []>} : vector<4x32xbf16>, vector<32x32xbf16>, vector<4x32xf32> -> vector<4x32xf32>
    %cst_16 = arith.constant dense<0.000000e+00> : vector<4x32xf32>
    %17 = tpu.matmul %14, %8, %cst_16 {dimension_numbers = #tpu.dot_dimension_numbers<[1], [0], [0], [1], [0, 0, 1, 1], [], []>} : vector<4x32xbf16>, vector<32x32xbf16>, vector<4x32xf32> -> vector<4x32xf32>
    %18 = vector.extract_strided_slice %13 {offsets = [0, 0, 0], sizes = [1, 4, 32], strides = [1, 1, 1]} : vector<3x4x32xbf16> to vector<1x4x32xbf16>
    %19 = vector.shape_cast %18 : vector<1x4x32xbf16> to vector<4x32xbf16>
    %20 = arith.extf %19 : vector<4x32xbf16> to vector<4x32xf32>
    %21 = arith.addf %20, %15 : vector<4x32xf32>
    %22 = arith.negf %21 : vector<4x32xf32>
    %23 = math.exp %22 : vector<4x32xf32>
    %cst_17 = arith.constant 1.000000e+00 : f32
    %24 = vector.broadcast %cst_17 : f32 to vector<4x32xf32>
    %25 = arith.addf %24, %23 : vector<4x32xf32>
    %26 = arith.divf %24, %25 : vector<4x32xf32>
    %27 = vector.extract_strided_slice %13 {offsets = [1, 0, 0], sizes = [1, 4, 32], strides = [1, 1, 1]} : vector<3x4x32xbf16> to vector<1x4x32xbf16>
    %28 = vector.shape_cast %27 : vector<1x4x32xbf16> to vector<4x32xbf16>
    %29 = arith.extf %28 : vector<4x32xbf16> to vector<4x32xf32>
    %30 = arith.addf %29, %16 : vector<4x32xf32>
    %31 = arith.negf %30 : vector<4x32xf32>
    %32 = math.exp %31 : vector<4x32xf32>
    %cst_18 = arith.constant 1.000000e+00 : f32
    %33 = vector.broadcast %cst_18 : f32 to vector<4x32xf32>
    %34 = arith.addf %33, %32 : vector<4x32xf32>
    %35 = arith.divf %33, %34 : vector<4x32xf32>
    %36 = vector.extract_strided_slice %13 {offsets = [2, 0, 0], sizes = [1, 4, 32], strides = [1, 1, 1]} : vector<3x4x32xbf16> to vector<1x4x32xbf16>
    %37 = vector.shape_cast %36 : vector<1x4x32xbf16> to vector<4x32xbf16>
    %38 = arith.extf %37 : vector<4x32xbf16> to vector<4x32xf32>
    %39 = vector.broadcast %9 : vector<1x32xf32> to vector<4x32xf32>
    %40 = arith.addf %17, %39 : vector<4x32xf32>
    %41 = arith.mulf %26, %40 : vector<4x32xf32>
    %42 = arith.addf %38, %41 : vector<4x32xf32>
    %43 = math.tanh %42 : vector<4x32xf32>
    %cst_19 = arith.constant 1.000000e+00 : f32
    %44 = vector.broadcast %cst_19 : f32 to vector<4x32xf32>
    %45 = arith.subf %44, %35 : vector<4x32xf32>
    %46 = arith.mulf %45, %43 : vector<4x32xf32>
    %47 = arith.mulf %35, %10 : vector<4x32xf32>
    %48 = arith.addf %46, %47 : vector<4x32xf32>
    %49 = arith.truncf %48 : vector<4x32xf32> to vector<4x32xbf16>
    %50 = arith.index_cast %c0_i32_11 : i32 to index
    %c0_20 = arith.constant 0 : index
    %c0_21 = arith.constant 0 : index
    %51 = vector.load %arg6[%50, %c0_20, %c0_21] : memref<4x4x32xbf16, #tpu.memory_space<vmem>>, vector<1x4x32xbf16>
    %52 = vector.shape_cast %51 : vector<1x4x32xbf16> to vector<4x32xbf16>
    %53 = vector.shape_cast %49 : vector<4x32xbf16> to vector<1x4x32xbf16>
    tpu.vector_store %arg6[%50, %c0_20, %c0_21], %53 {strides = array<i32>} : memref<4x4x32xbf16, #tpu.memory_space<vmem>>, vector<1x4x32xbf16>,
    %c1_i32 = arith.constant 1 : i32
    %54 = arith.index_cast %c1_i32 : i32 to index
    %c0_22 = arith.constant 0 : index
    %c0_23 = arith.constant 0 : index
    %c0_24 = arith.constant 0 : index
    %55 = vector.load %arg2[%54, %c0_22, %c0_23, %c0_24] : memref<4x3x4x32xbf16, #tpu.memory_space<vmem>>, vector<1x3x4x32xbf16>
    %56 = vector.shape_cast %55 : vector<1x3x4x32xbf16> to vector<3x4x32xbf16>
    %57 = arith.truncf %48 : vector<4x32xf32> to vector<4x32xbf16>
    %cst_25 = arith.constant dense<0.000000e+00> : vector<4x32xf32>
    %58 = tpu.matmul %57, %4, %cst_25 {dimension_numbers = #tpu.dot_dimension_numbers<[1], [0], [0], [1], [0, 0, 1, 1], [], []>} : vector<4x32xbf16>, vector<32x32xbf16>, vector<4x32xf32> -> vector<4x32xf32>
    %cst_26 = arith.constant dense<0.000000e+00> : vector<4x32xf32>
    %59 = tpu.matmul %57, %6, %cst_26 {dimension_numbers = #tpu.dot_dimension_numbers<[1], [0], [0], [1], [0, 0, 1, 1], [], []>} : vector<4x32xbf16>, vector<32x32xbf16>, vector<4x32xf32> -> vector<4x32xf32>
    %cst_27 = arith.constant dense<0.000000e+00> : vector<4x32xf32>
    %60 = tpu.matmul %57, %8, %cst_27 {dimension_numbers = #tpu.dot_dimension_numbers<[1], [0], [0], [1], [0, 0, 1, 1], [], []>} : vector<4x32xbf16>, vector<32x32xbf16>, vector<4x32xf32> -> vector<4x32xf32>
    %61 = vector.extract_strided_slice %56 {offsets = [0, 0, 0], sizes = [1, 4, 32], strides = [1, 1, 1]} : vector<3x4x32xbf16> to vector<1x4x32xbf16>
    %62 = vector.shape_cast %61 : vector<1x4x32xbf16> to vector<4x32xbf16>
    %63 = arith.extf %62 : vector<4x32xbf16> to vector<4x32xf32>
    %64 = arith.addf %63, %58 : vector<4x32xf32>
    %65 = arith.negf %64 : vector<4x32xf32>
    %66 = math.exp %65 : vector<4x32xf32>
    %cst_28 = arith.constant 1.000000e+00 : f32
    %67 = vector.broadcast %cst_28 : f32 to vector<4x32xf32>
    %68 = arith.addf %67, %66 : vector<4x32xf32>
    %69 = arith.divf %67, %68 : vector<4x32xf32>
    %70 = vector.extract_strided_slice %56 {offsets = [1, 0, 0], sizes = [1, 4, 32], strides = [1, 1, 1]} : vector<3x4x32xbf16> to vector<1x4x32xbf16>
    %71 = vector.shape_cast %70 : vector<1x4x32xbf16> to vector<4x32xbf16>
    %72 = arith.extf %71 : vector<4x32xbf16> to vector<4x32xf32>
    %73 = arith.addf %72, %59 : vector<4x32xf32>
    %74 = arith.negf %73 : vector<4x32xf32>
    %75 = math.exp %74 : vector<4x32xf32>
    %cst_29 = arith.constant 1.000000e+00 : f32
    %76 = vector.broadcast %cst_29 : f32 to vector<4x32xf32>
    %77 = arith.addf %76, %75 : vector<4x32xf32>
    %78 = arith.divf %76, %77 : vector<4x32xf32>
    %79 = vector.extract_strided_slice %56 {offsets = [2, 0, 0], sizes = [1, 4, 32], strides = [1, 1, 1]} : vector<3x4x32xbf16> to vector<1x4x32xbf16>
    %80 = vector.shape_cast %79 : vector<1x4x32xbf16> to vector<4x32xbf16>
    %81 = arith.extf %80 : vector<4x32xbf16> to vector<4x32xf32>
    %82 = vector.broadcast %9 : vector<1x32xf32> to vector<4x32xf32>
    %83 = arith.addf %60, %82 : vector<4x32xf32>
    %84 = arith.mulf %69, %83 : vector<4x32xf32>
    %85 = arith.addf %81, %84 : vector<4x32xf32>
    %86 = math.tanh %85 : vector<4x32xf32>
    %cst_30 = arith.constant 1.000000e+00 : f32
    %87 = vector.broadcast %cst_30 : f32 to vector<4x32xf32>
    %88 = arith.subf %87, %78 : vector<4x32xf32>
    %89 = arith.mulf %88, %86 : vector<4x32xf32>
    %90 = arith.mulf %78, %48 : vector<4x32xf32>
    %91 = arith.addf %89, %90 : vector<4x32xf32>
    %92 = arith.truncf %91 : vector<4x32xf32> to vector<4x32xbf16>
    %93 = arith.index_cast %c1_i32 : i32 to index
    %c0_31 = arith.constant 0 : index
    %c0_32 = arith.constant 0 : index
    %94 = vector.load %arg6[%93, %c0_31, %c0_32] : memref<4x4x32xbf16, #tpu.memory_space<vmem>>, vector<1x4x32xbf16>
    %95 = vector.shape_cast %94 : vector<1x4x32xbf16> to vector<4x32xbf16>
    %96 = vector.shape_cast %92 : vector<4x32xbf16> to vector<1x4x32xbf16>
    tpu.vector_store %arg6[%93, %c0_31, %c0_32], %96 {strides = array<i32>} : memref<4x4x32xbf16, #tpu.memory_space<vmem>>, vector<1x4x32xbf16>,
    %c2_i32 = arith.constant 2 : i32
    %97 = arith.index_cast %c2_i32 : i32 to index
    %c0_33 = arith.constant 0 : index
    %c0_34 = arith.constant 0 : index
    %c0_35 = arith.constant 0 : index
    %98 = vector.load %arg2[%97, %c0_33, %c0_34, %c0_35] : memref<4x3x4x32xbf16, #tpu.memory_space<vmem>>, vector<1x3x4x32xbf16>
    %99 = vector.shape_cast %98 : vector<1x3x4x32xbf16> to vector<3x4x32xbf16>
    %100 = arith.truncf %91 : vector<4x32xf32> to vector<4x32xbf16>
    %cst_36 = arith.constant dense<0.000000e+00> : vector<4x32xf32>
    %101 = tpu.matmul %100, %4, %cst_36 {dimension_numbers = #tpu.dot_dimension_numbers<[1], [0], [0], [1], [0, 0, 1, 1], [], []>} : vector<4x32xbf16>, vector<32x32xbf16>, vector<4x32xf32> -> vector<4x32xf32>
    %cst_37 = arith.constant dense<0.000000e+00> : vector<4x32xf32>
    %102 = tpu.matmul %100, %6, %cst_37 {dimension_numbers = #tpu.dot_dimension_numbers<[1], [0], [0], [1], [0, 0, 1, 1], [], []>} : vector<4x32xbf16>, vector<32x32xbf16>, vector<4x32xf32> -> vector<4x32xf32>
    %cst_38 = arith.constant dense<0.000000e+00> : vector<4x32xf32>
    %103 = tpu.matmul %100, %8, %cst_38 {dimension_numbers = #tpu.dot_dimension_numbers<[1], [0], [0], [1], [0, 0, 1, 1], [], []>} : vector<4x32xbf16>, vector<32x32xbf16>, vector<4x32xf32> -> vector<4x32xf32>
    %104 = vector.extract_strided_slice %99 {offsets = [0, 0, 0], sizes = [1, 4, 32], strides = [1, 1, 1]} : vector<3x4x32xbf16> to vector<1x4x32xbf16>
    %105 = vector.shape_cast %104 : vector<1x4x32xbf16> to vector<4x32xbf16>
    %106 = arith.extf %105 : vector<4x32xbf16> to vector<4x32xf32>
    %107 = arith.addf %106, %101 : vector<4x32xf32>
    %108 = arith.negf %107 : vector<4x32xf32>
    %109 = math.exp %108 : vector<4x32xf32>
    %cst_39 = arith.constant 1.000000e+00 : f32
    %110 = vector.broadcast %cst_39 : f32 to vector<4x32xf32>
    %111 = arith.addf %110, %109 : vector<4x32xf32>
    %112 = arith.divf %110, %111 : vector<4x32xf32>
    %113 = vector.extract_strided_slice %99 {offsets = [1, 0, 0], sizes = [1, 4, 32], strides = [1, 1, 1]} : vector<3x4x32xbf16> to vector<1x4x32xbf16>
    %114 = vector.shape_cast %113 : vector<1x4x32xbf16> to vector<4x32xbf16>
    %115 = arith.extf %114 : vector<4x32xbf16> to vector<4x32xf32>
    %116 = arith.addf %115, %102 : vector<4x32xf32>
    %117 = arith.negf %116 : vector<4x32xf32>
    %118 = math.exp %117 : vector<4x32xf32>
    %cst_40 = arith.constant 1.000000e+00 : f32
    %119 = vector.broadcast %cst_40 : f32 to vector<4x32xf32>
    %120 = arith.addf %119, %118 : vector<4x32xf32>
    %121 = arith.divf %119, %120 : vector<4x32xf32>
    %122 = vector.extract_strided_slice %99 {offsets = [2, 0, 0], sizes = [1, 4, 32], strides = [1, 1, 1]} : vector<3x4x32xbf16> to vector<1x4x32xbf16>
    %123 = vector.shape_cast %122 : vector<1x4x32xbf16> to vector<4x32xbf16>
    %124 = arith.extf %123 : vector<4x32xbf16> to vector<4x32xf32>
    %125 = vector.broadcast %9 : vector<1x32xf32> to vector<4x32xf32>
    %126 = arith.addf %103, %125 : vector<4x32xf32>
    %127 = arith.mulf %112, %126 : vector<4x32xf32>
    %128 = arith.addf %124, %127 : vector<4x32xf32>
    %129 = math.tanh %128 : vector<4x32xf32>
    %cst_41 = arith.constant 1.000000e+00 : f32
    %130 = vector.broadcast %cst_41 : f32 to vector<4x32xf32>
    %131 = arith.subf %130, %121 : vector<4x32xf32>
    %132 = arith.mulf %131, %129 : vector<4x32xf32>
    %133 = arith.mulf %121, %91 : vector<4x32xf32>
    %134 = arith.addf %132, %133 : vector<4x32xf32>
    %135 = arith.truncf %134 : vector<4x32xf32> to vector<4x32xbf16>
    %136 = arith.index_cast %c2_i32 : i32 to index
    %c0_42 = arith.constant 0 : index
    %c0_43 = arith.constant 0 : index
    %137 = vector.load %arg6[%136, %c0_42, %c0_43] : memref<4x4x32xbf16, #tpu.memory_space<vmem>>, vector<1x4x32xbf16>
    %138 = vector.shape_cast %137 : vector<1x4x32xbf16> to vector<4x32xbf16>
    %139 = vector.shape_cast %135 : vector<4x32xbf16> to vector<1x4x32xbf16>
    tpu.vector_store %arg6[%136, %c0_42, %c0_43], %139 {strides = array<i32>} : memref<4x4x32xbf16, #tpu.memory_space<vmem>>, vector<1x4x32xbf16>,
    %c3_i32 = arith.constant 3 : i32
    %140 = arith.index_cast %c3_i32 : i32 to index
    %c0_44 = arith.constant 0 : index
    %c0_45 = arith.constant 0 : index
    %c0_46 = arith.constant 0 : index
    %141 = vector.load %arg2[%140, %c0_44, %c0_45, %c0_46] : memref<4x3x4x32xbf16, #tpu.memory_space<vmem>>, vector<1x3x4x32xbf16>
    %142 = vector.shape_cast %141 : vector<1x3x4x32xbf16> to vector<3x4x32xbf16>
    %143 = arith.truncf %134 : vector<4x32xf32> to vector<4x32xbf16>
    %cst_47 = arith.constant dense<0.000000e+00> : vector<4x32xf32>
    %144 = tpu.matmul %143, %4, %cst_47 {dimension_numbers = #tpu.dot_dimension_numbers<[1], [0], [0], [1], [0, 0, 1, 1], [], []>} : vector<4x32xbf16>, vector<32x32xbf16>, vector<4x32xf32> -> vector<4x32xf32>
    %cst_48 = arith.constant dense<0.000000e+00> : vector<4x32xf32>
    %145 = tpu.matmul %143, %6, %cst_48 {dimension_numbers = #tpu.dot_dimension_numbers<[1], [0], [0], [1], [0, 0, 1, 1], [], []>} : vector<4x32xbf16>, vector<32x32xbf16>, vector<4x32xf32> -> vector<4x32xf32>
    %cst_49 = arith.constant dense<0.000000e+00> : vector<4x32xf32>
    %146 = tpu.matmul %143, %8, %cst_49 {dimension_numbers = #tpu.dot_dimension_numbers<[1], [0], [0], [1], [0, 0, 1, 1], [], []>} : vector<4x32xbf16>, vector<32x32xbf16>, vector<4x32xf32> -> vector<4x32xf32>
    %147 = vector.extract_strided_slice %142 {offsets = [0, 0, 0], sizes = [1, 4, 32], strides = [1, 1, 1]} : vector<3x4x32xbf16> to vector<1x4x32xbf16>
    %148 = vector.shape_cast %147 : vector<1x4x32xbf16> to vector<4x32xbf16>
    %149 = arith.extf %148 : vector<4x32xbf16> to vector<4x32xf32>
    %150 = arith.addf %149, %144 : vector<4x32xf32>
    %151 = arith.negf %150 : vector<4x32xf32>
    %152 = math.exp %151 : vector<4x32xf32>
    %cst_50 = arith.constant 1.000000e+00 : f32
    %153 = vector.broadcast %cst_50 : f32 to vector<4x32xf32>
    %154 = arith.addf %153, %152 : vector<4x32xf32>
    %155 = arith.divf %153, %154 : vector<4x32xf32>
    %156 = vector.extract_strided_slice %142 {offsets = [1, 0, 0], sizes = [1, 4, 32], strides = [1, 1, 1]} : vector<3x4x32xbf16> to vector<1x4x32xbf16>
    %157 = vector.shape_cast %156 : vector<1x4x32xbf16> to vector<4x32xbf16>
    %158 = arith.extf %157 : vector<4x32xbf16> to vector<4x32xf32>
    %159 = arith.addf %158, %145 : vector<4x32xf32>
    %160 = arith.negf %159 : vector<4x32xf32>
    %161 = math.exp %160 : vector<4x32xf32>
    %cst_51 = arith.constant 1.000000e+00 : f32
    %162 = vector.broadcast %cst_51 : f32 to vector<4x32xf32>
    %163 = arith.addf %162, %161 : vector<4x32xf32>
    %164 = arith.divf %162, %163 : vector<4x32xf32>
    %165 = vector.extract_strided_slice %142 {offsets = [2, 0, 0], sizes = [1, 4, 32], strides = [1, 1, 1]} : vector<3x4x32xbf16> to vector<1x4x32xbf16>
    %166 = vector.shape_cast %165 : vector<1x4x32xbf16> to vector<4x32xbf16>
    %167 = arith.extf %166 : vector<4x32xbf16> to vector<4x32xf32>
    %168 = vector.broadcast %9 : vector<1x32xf32> to vector<4x32xf32>
    %169 = arith.addf %146, %168 : vector<4x32xf32>
    %170 = arith.mulf %155, %169 : vector<4x32xf32>
    %171 = arith.addf %167, %170 : vector<4x32xf32>
    %172 = math.tanh %171 : vector<4x32xf32>
    %cst_52 = arith.constant 1.000000e+00 : f32
    %173 = vector.broadcast %cst_52 : f32 to vector<4x32xf32>
    %174 = arith.subf %173, %164 : vector<4x32xf32>
    %175 = arith.mulf %174, %172 : vector<4x32xf32>
    %176 = arith.mulf %164, %134 : vector<4x32xf32>
    %177 = arith.addf %175, %176 : vector<4x32xf32>
    %178 = arith.truncf %177 : vector<4x32xf32> to vector<4x32xbf16>
    %179 = arith.index_cast %c3_i32 : i32 to index
    %c0_53 = arith.constant 0 : index
    %c0_54 = arith.constant 0 : index
    %180 = vector.load %arg6[%179, %c0_53, %c0_54] : memref<4x4x32xbf16, #tpu.memory_space<vmem>>, vector<1x4x32xbf16>
    %181 = vector.shape_cast %180 : vector<1x4x32xbf16> to vector<4x32xbf16>
    %182 = vector.shape_cast %178 : vector<4x32xbf16> to vector<1x4x32xbf16>
    tpu.vector_store %arg6[%179, %c0_53, %c0_54], %182 {strides = array<i32>} : memref<4x4x32xbf16, #tpu.memory_space<vmem>>, vector<1x4x32xbf16>,
    %c4_i32 = arith.constant 4 : i32
    %c0_55 = arith.constant 0 : index
    %c0_56 = arith.constant 0 : index
    %183 = vector.load %arg8[%c0_55, %c0_56] : memref<4x32xf32, #tpu.memory_space<vmem>>, vector<4x32xf32>
    tpu.vector_store %arg8[%c0_55, %c0_56], %177 {strides = array<i32>} : memref<4x32xf32, #tpu.memory_space<vmem>>, vector<4x32xf32>,
    %c0_57 = arith.constant 0 : index
    %c0_58 = arith.constant 0 : index
    %184 = vector.load %arg7[%c0_57, %c0_58] : memref<4x32xf32, #tpu.memory_space<vmem>>, vector<4x32xf32>
    tpu.vector_store %arg7[%c0_57, %c0_58], %177 {strides = array<i32>} : memref<4x32xf32, #tpu.memory_space<vmem>>, vector<4x32xf32>,
    return
  }
  func.func @transform_0(%arg0: i32, %arg1: i32) -> (i32, i32, i32, i32) {
    %c0_i32 = arith.constant 0 : i32
    %c0_i32_0 = arith.constant 0 : i32
    %c0_i32_1 = arith.constant 0 : i32
    return %arg1, %c0_i32, %arg0, %c0_i32_0 : i32, i32, i32, i32
  }
  func.func @transform_1(%arg0: i32, %arg1: i32) -> (i32, i32) {
    %c0_i32 = arith.constant 0 : i32
    %c0_i32_0 = arith.constant 0 : i32
    return %arg0, %c0_i32 : i32, i32
  }
  func.func @transform_2(%arg0: i32, %arg1: i32) -> (i32, i32, i32) {
    %c0_i32 = arith.constant 0 : i32
    %c0_i32_0 = arith.constant 0 : i32
    %c0_i32_1 = arith.constant 0 : i32
    %c0_i32_2 = arith.constant 0 : i32
    return %c0_i32, %c0_i32_0, %c0_i32_1 : i32, i32, i32
  }
  func.func @transform_3(%arg0: i32, %arg1: i32) -> (i32, i32) {
    %c0_i32 = arith.constant 0 : i32
    %c0_i32_0 = arith.constant 0 : i32
    %c0_i32_1 = arith.constant 0 : i32
    return %c0_i32, %c0_i32_0 : i32, i32
  }
  func.func @transform_4(%arg0: i32, %arg1: i32) -> (i32, i32, i32) {
    %c0_i32 = arith.constant 0 : i32
    %c0_i32_0 = arith.constant 0 : i32
    return %arg1, %arg0, %c0_i32 : i32, i32, i32
  }
  func.func @transform_5(%arg0: i32, %arg1: i32) -> (i32, i32) {
    %c0_i32 = arith.constant 0 : i32
    %c0_i32_0 = arith.constant 0 : i32
    return %arg0, %c0_i32 : i32, i32
  }
}

</mosaic_0001>

<bundles_post_ra>
// kernel: gru_seq2seq_decoder.5
= control target key start
LH: loop header
LB: loop body
LE: loop exit
PB: predicated region body
PF: predicated region fallthrough
CT: control target
= control target key end

     0   :  { %s193_s0 = inlined_call_operand.vmem [shape: bf16[32,32], index: 0, kind: input, shape index: {}]   ;;  %s194_s1 = inlined_call_operand.vmem [shape: bf16[32,128], index: 1, kind: input, shape index: {}]   ;;  %s195_s2 = inlined_call_operand.vmem [shape: f32[1,128], index: 2, kind: input, shape index: {}]   ;;  %s196_s3 = inlined_call_operand.hbm [shape: f32[32,128], index: 3, kind: output, shape index: {}]  }
   0x1   :  { %v119_v0 = vld [vmem:[%s194_s1 + $0x8] sm:$0xff]  ;;  %v118_v1 = vld [vmem:[%s194_s1] sm:$0xff] }
   0x2   :  { %63 = vmatpush.bf16.msra.mxu0 %v119_v0  ;;  %120 = vmatpush.bf16.msra.mxu1 %v119_v0 }
   0x3   :  { %8 = vsyncpa [#allocation3], 0  ;;  %v116_v2 = vld [vmem:[%s193_s0] sm:$0xff]  ;;  %v117_v3 = vld [vmem:[%s193_s0 + $0x8] sm:$0xff]  ;;  %vm50_vm0 = vcmask 261120   ;;  %s152_s1 = smov [#allocation2]  }
   0x4   :  { %v125_v4 = vld [vmem:[%s195_s2] ss:$0 sm:$0xff]  ;;  %s84_s22 = sshll.u32 %s152_s1, 4  ;;  %s86_s0 = sshll.u32 %s196_s3, 4  ;;  %s85_s22 = int_to_ptr.vmem [resolvable:$true] %s84_s22  ;;  %s87_s0 = int_to_ptr.hbm [resolvable:$true] %s86_s0 }
   0x5   :  { %s153_s2 = smov 128   ;;  %s154_s25 = smov 8  }
   0x6   :  { %64 = vmatpush.bf16.msra.mxu0 %v118_v1  ;;  %121 = vmatpush.bf16.msra.mxu1 %v118_v1 }
   0x9   :  { %114 = vmatmul.msk.bf16.vlgmr.msra.gmra.mxu0 %vm50_vm0, %v116_v2  ;;  %115 = vmatmul.msk.bf16.vlgmr.msra.gmra.mxu1 %vm50_vm0, %v117_v3 }
  0x86   :  { %v66_v5 = vpop.f32.mrf.mxu0  ;;  %v71_v6 = vpop.f32.mrf.mxu1 }
  0x87   :  { %v67_v7 = vadd.f32 %v125_v4, %v66_v5  ;;  %v72_v8 = vadd.f32 %v125_v4, %v71_v6 }
  0x89   :  { %76 = vst [vmem:[#allocation2] sm:$0xff] %v67_v7 }
  0x8a   :  { %78 = vst [vmem:[#allocation2 + $0x10] sm:$0xff] %v72_v8 }
  0x8e   :  { %v68_v9 = vpop.f32.mrf.mxu0  ;;  %v73_v10 = vpop.f32.mrf.mxu1 }
  0x8f   :  { %v69_v11 = vadd.f32 %v125_v4, %v68_v9  ;;  %v74_v12 = vadd.f32 %v125_v4, %v73_v10 }
  0x91   :  { %77 = vst [vmem:[#allocation2 + $0x8] sm:$0xff] %v69_v11 }
  0x92   :  { %79 = vst [vmem:[#allocation2 + $0x18] sm:$0xff] %v74_v12 }
  0x93   :  { %92 = dma.vmem_to_hbm [thread:$0]  %s85_s22, 512, %s87_s0, [#allocation3], %s153_s2, %s153_s2, %s154_s25  }
  0x94   :  { %150 = dma.done.wait [#allocation3], 512  }
  0x95   :  { %151 = vsyncadd [#allocation3], 4294966784 }
  0x96   :  { %97 = vsyncpa [#allocation3], 1 }

// kernel: gru_seq2seq_decoder.3
= control target key start
LH: loop header
LB: loop body
LE: loop exit
PB: predicated region body
PF: predicated region fallthrough
CT: control target
= control target key end

     0   :  { %s573_s12 = smov 0   ;;  %s650_s0 = inlined_call_operand.vmem [shape: bf16[8,4,16], index: 0, kind: input, shape index: {}]   ;;  %s651_s1 = inlined_call_operand.vmem [shape: bf16[3,16,32], index: 1, kind: input, shape index: {}]   ;;  %s652_s2 = inlined_call_operand.vmem [shape: f32[3,4,32], index: 2, kind: input, shape index: {}]   ;;  %s653_s3 = inlined_call_operand.vmem [shape: bf16[8,3,4,32], index: 3, kind: output, shape index: {}]  }
   0x1 LB: > { %s478_s13 = sadd.s32 4294967295, %s551_s12   ;;  %p482_p0 = scmp.ge.s32.totalorder %s551_s12, 1  ;;  %s551_s12 = sphi %s573_s12, %s13_s12  }
   0x2   : > { %p138_p1 = scmp.lt.s32.totalorder %s551_s12, 3 }
   0x4   : > { %p139_p2 = pnand %p482_p0, %p138_p1 }
   0x5   : > { %s483_s20 = sshll.u32 (!%p139_p2), %s478_s13, 2 }
   0x6   : > { %142 = sbr.rel (%p139_p2) target bundleno = 190 (0xbe), region = 32  ;;  %p164_p3 = scmp.lt.s32.totalorder (!%p139_p2), %s483_s20, 7 }
   0xb   : > { %v533_v0 = vld [vmem:[%s651_s1] sm:$0xff]  ;;  %v534_v1 = vld [vmem:[%s651_s1 + $0x8] sm:$0xff]  ;;  %v535_v2 = vld [vmem:[%s651_s1 + $0x10] sm:$0xff]  ;;  %s655_s20 = smov (!%p164_p3, %s483_s20), 7  ;;  %vm197_vm0 = vcmask 130048   ;;  %vm215_vm1 = vcmask 254976  }
   0xc   : > { %208 = vmatpush.bf16.msra.mxu0 %v533_v0  ;;  %230 = vmatpush.bf16.msra.mxu1 %v534_v1  ;;  %s484_s21 = sshll.u32 %s655_s20, 1  ;;  %s536_s25 = smul.u32 6, %s655_s20  ;;  %v185_v7 = vld [vmem:[%s652_s2] sm:$0xf]  ;;  %v491_v8 = vld [vmem:[%s652_s2 + $0x4] sm:$0xf] }
   0xd   : > { %252 = vmatpush.bf16.msra.mxu2 %v535_v2  ;;  %273 = vmatpush.bf16.msra.mxu3 %v533_v0  ;;  %s167_s24 = scalar_lea.vmem %s650_s0, %s484_s21  ;;  %v492_v15 = vld [vmem:[%s652_s2 + $0x8] sm:$0xf] }
   0xe   : > { %v190_v3 = vld [vmem:[%s167_s24] sm:$0x3]  ;;  %v510_v4 = vld [vmem:[%s167_s24 + $0x2] sm:$0x3]  ;;  %v517_v5 = vld [vmem:[%s167_s24 + $0x4] sm:$0x3]  ;;  %s618_s5 = scalar_lea.vmem %s653_s3, %s536_s25 }
   0xf   : > { %497 = vmatmul.msk.bf16.vlgmr.msra.gmra.mxu0 %vm197_vm0, %v190_v3  ;;  %502 = vmatmul.msk.bf16.vlgmr.msra.gmra.mxu1 %vm197_vm0, %v190_v3  ;;  %v524_v6 = vld [vmem:[%s167_s24 + $0x6] sm:$0x3] }
  0x10   : > { %289 = vmatpush.bf16.msrb.mxu0 %v534_v1  ;;  %305 = vmatpush.bf16.msrb.mxu1 %v535_v2 }
  0x11   : > { %326 = vmatpush.bf16.msrb.mxu2 %v533_v0  ;;  %342 = vmatpush.bf16.msrb.mxu3 %v534_v1 }
  0x12   : > { %508 = vmatmul.msk.bf16.vlgmr.msra.gmra.mxu2 %vm197_vm0, %v190_v3  ;;  %511 = vmatmul.msk.bf16.vlgmr.msra.gmra.mxu3 %vm197_vm0, %v510_v4 }
  0x14   : > { %358 = vmatpush.bf16.msra.mxu0 %v535_v2  ;;  %379 = vmatpush.bf16.msra.mxu1 %v533_v0 }
  0x15   : > { %395 = vmatpush.bf16.msra.mxu2 %v534_v1  ;;  %411 = vmatpush.bf16.msra.mxu3 %v535_v2 }
  0x1f   : > { %513 = vmatmul.msk.bf16.vlgmr.msrb.gmra.mxu0 %vm197_vm0, %v510_v4  ;;  %515 = vmatmul.msk.bf16.vlgmr.msrb.gmra.mxu1 %vm197_vm0, %v510_v4 }
  0x22   : > { %518 = vmatmul.msk.bf16.vlgmr.msrb.gmra.mxu2 %vm197_vm0, %v517_v5  ;;  %520 = vmatmul.msk.bf16.vlgmr.msrb.gmra.mxu3 %vm197_vm0, %v517_v5 }
  0x2f   : > { %522 = vmatmul.msk.bf16.vlgmr.msra.gmra.mxu0 %vm197_vm0, %v517_v5  ;;  %525 = vmatmul.msk.bf16.vlgmr.msra.gmra.mxu1 %vm197_vm0, %v524_v6 }
  0x32   : > { %527 = vmatmul.msk.bf16.vlgmr.msra.gmra.mxu2 %vm197_vm0, %v524_v6  ;;  %529 = vmatmul.msk.bf16.vlgmr.msra.gmra.mxu3 %vm197_vm0, %v524_v6 }
  0x8c   : > { %v210_v9 = vpop.f32.mrf.mxu0  ;;  %v232_v10 = vpop.f32.mrf.mxu1 }
  0x8d   : > { %v211_v11 = vadd.f32 %v210_v9, %v185_v7  ;;  %v233_v12 = vadd.f32 %v491_v8, %v232_v10 }
  0x8f   : > { %v214_v13 = vpack.c.bf16 %v211_v11, %v211_v11  ;;  %v236_v14 = vpack.c.bf16 %v233_v12, %v233_v12 }
  0x91   : > { %216 = vst.msk [vmem:[%s618_s5] sm:$0x3] %vm215_vm1, %v214_v13 }
  0x92   : > { %503 = vst.msk [vmem:[%s618_s5 + $0x2] sm:$0x3] %vm215_vm1, %v236_v14 }
  0x94   : > { %v212_v20 = vpop.f32.mrf.mxu0  ;;  %v234_v21 = vpop.f32.mrf.mxu1 }
  0x95   : > { %v254_v16 = vpop.f32.mrf.mxu2  ;;  %v275_v17 = vpop.f32.mrf.mxu3 }
  0x96   : > { %v255_v18 = vadd.f32 %v492_v15, %v254_v16  ;;  %v276_v19 = vadd.f32 %v275_v17, %v185_v7 }
  0x98   : > { %v258_v22 = vpack.c.bf16 %v255_v18, %v255_v18  ;;  %v279_v23 = vpack.c.bf16 %v276_v19, %v276_v19 }
  0x9a   : > { %509 = vst.msk [vmem:[%s618_s5 + $0x4] sm:$0x3] %vm215_vm1, %v258_v22 }
  0x9b   : > { %512 = vst.msk [vmem:[%s618_s5 + $0x6] sm:$0x3] %vm215_vm1, %v279_v23 }
  0x9c   : > { %v291_v26 = vpop.f32.mrf.mxu0  ;;  %v307_v27 = vpop.f32.mrf.mxu1 }
  0x9d   : > { %v256_v24 = vpop.f32.mrf.mxu2  ;;  %v277_v25 = vpop.f32.mrf.mxu3  ;;  %v292_v28 = vadd.f32 %v491_v8, %v291_v26  ;;  %v308_v29 = vadd.f32 %v492_v15, %v307_v27 }
  0x9f   : > { %v295_v30 = vpack.c.bf16 %v292_v28, %v292_v28  ;;  %v311_v31 = vpack.c.bf16 %v308_v29, %v308_v29 }
  0xa1   : > { %514 = vst.msk [vmem:[%s618_s5 + $0x8] sm:$0x3] %vm215_vm1, %v295_v30 }
  0xa2   : > { %516 = vst.msk [vmem:[%s618_s5 + $0xa] sm:$0x3] %vm215_vm1, %v311_v31 }
  0xa4   : > { %v293_v36 = vpop.f32.mrf.mxu0  ;;  %v309_v37 = vpop.f32.mrf.mxu1 }
  0xa5   : > { %v328_v32 = vpop.f32.mrf.mxu2  ;;  %v344_v33 = vpop.f32.mrf.mxu3 }
  0xa6   : > { %v329_v34 = vadd.f32 %v328_v32, %v185_v7  ;;  %v345_v35 = vadd.f32 %v491_v8, %v344_v33 }
  0xa8   : > { %v332_v38 = vpack.c.bf16 %v329_v34, %v329_v34  ;;  %v348_v39 = vpack.c.bf16 %v345_v35, %v345_v35 }
  0xaa   : > { %519 = vst.msk [vmem:[%s618_s5 + $0xc] sm:$0x3] %vm215_vm1, %v332_v38 }
  0xab   : > { %521 = vst.msk [vmem:[%s618_s5 + $0xe] sm:$0x3] %vm215_vm1, %v348_v39 }
  0xac   : > { %v360_v42 = vpop.f32.mrf.mxu0  ;;  %v381_v43 = vpop.f32.mrf.mxu1 }
  0xad   : > { %v330_v40 = vpop.f32.mrf.mxu2  ;;  %v346_v41 = vpop.f32.mrf.mxu3  ;;  %v361_v44 = vadd.f32 %v492_v15, %v360_v42  ;;  %v382_v45 = vadd.f32 %v381_v43, %v185_v7 }
  0xaf   : > { %v364_v46 = vpack.c.bf16 %v361_v44, %v361_v44  ;;  %v385_v47 = vpack.c.bf16 %v382_v45, %v382_v45 }
  0xb1   : > { %523 = vst.msk [vmem:[%s618_s5 + $0x10] sm:$0x3] %vm215_vm1, %v364_v46 }
  0xb2   : > { %526 = vst.msk [vmem:[%s618_s5 + $0x12] sm:$0x3] %vm215_vm1, %v385_v47 }
  0xb4   : > { %v362_v52 = vpop.f32.mrf.mxu0  ;;  %v383_v53 = vpop.f32.mrf.mxu1 }
  0xb5   : > { %v397_v48 = vpop.f32.mrf.mxu2  ;;  %v413_v49 = vpop.f32.mrf.mxu3 }
  0xb6   : > { %v398_v50 = vadd.f32 %v491_v8, %v397_v48  ;;  %v414_v51 = vadd.f32 %v492_v15, %v413_v49 }
  0xb8   : > { %v401_v54 = vpack.c.bf16 %v398_v50, %v398_v50  ;;  %v417_v55 = vpack.c.bf16 %v414_v51, %v414_v51 }
  0xba   : > { %528 = vst.msk [vmem:[%s618_s5 + $0x14] sm:$0x3] %vm215_vm1, %v401_v54 }
  0xbb   : > { %530 = vst.msk [vmem:[%s618_s5 + $0x16] sm:$0x3] %vm215_vm1, %v417_v55 }
  0xbd   : > { %v399_v56 = vpop.f32.mrf.mxu2  ;;  %v415_v57 = vpop.f32.mrf.mxu3 }
  0xbe PF: > { %s13_s12 = sadd.s32 1, %s551_s12  }
  0xbf   : > { %p10_p4 = scmp.ge.s32.totalorder %s13_s12, 4  }
  0xc1   :  { %12 = sbr.rel (!%p10_p4) target bundleno = 1 (0x1), region = 80 }

// kernel: gru_seq2seq_decoder.4
= control target key start
LH: loop header
LB: loop body
LE: loop exit
PB: predicated region body
PF: predicated region fallthrough
CT: control target
= control target key end

     0   :  { %11 = vsyncpa [#allocation4], 0  ;;  %s1117_s18 = smov 0   ;;  %s1119_s19 = smov 0   ;;  %s1254_s0 = inlined_call_operand.vmem [shape: bf16[8,3,4,32], index: 0, kind: input, shape index: {}]   ;;  %s1255_s1 = inlined_call_operand.vmem [shape: f32[4,32], index: 1, kind: input, shape index: {}]   ;;  %s1256_s2 = inlined_call_operand.vmem [shape: bf16[3,32,32], index: 2, kind: input, shape index: {}]   ;;  %s1257_s3 = inlined_call_operand.vmem [shape: f32[1,32], index: 3, kind: input, shape index: {}]   ;;  %s1258_s4 = inlined_call_operand.vmem [shape: bf16[8,4,32], index: 4, kind: output, shape index: {0}]   ;;  %s1259_s5 = inlined_call_operand.hbm [shape: f32[4,32], index: 5, kind: output, shape index: {1}]  }
   0x1   :  { %s1121_s20 = smov 0  }
   0x2 LB: > { %s872_s21 = sadd.s32 4294967295, %s1084_s20   ;;  %s26_s22 = sadd.s32 1, %s1080_s19  ;;  %s1084_s20 = sphi %s1121_s20, %s17_s20   ;;  %s1080_s19 = sphi %s1119_s19, %s1261_s19   ;;  %s1076_s18 = sphi %s1117_s18, %s1260_s18  }
   0x3   : > { %p27_p0 = scmp.ge.s32.totalorder %s26_s22, 2  ;;  %p877_p1 = scmp.ge.s32.totalorder %s1084_s20, 1 }
   0x4   : > { %p221_p2 = scmp.lt.s32.totalorder %s1084_s20, 3 }
   0x5   : > { %s1263_s22 = smov (%p27_p0, %s26_s22), 0 }
   0x6   : > { %p222_p3 = pnand %p877_p1, %p221_p2 }
   0x7   : > { %s878_s23 = sshll.u32 (!%p222_p3), %s1076_s18, 2  ;;  %p882_p5 = scmp.ne.s32.totalorder (!%p222_p3), %s1076_s18, 0 }
   0x8   : > { %225 = sbr.rel (%p222_p3) target bundleno = 737 (0x2e1), region = 36  ;;  %p261_p4 = scmp.lt.s32.totalorder (!%p222_p3), %s878_s23, 7 }
   0xd   : > { %s1265_s23 = smov (!%p261_p4, %s878_s23), 7  ;;  %287 = sbr.rel (%p882_p5) target bundleno = 20 (0x14), region = 40 }
   0xe   : > { %s957_s24 = smul.u32 6, %s1265_s23  ;;  %s881_s25 = sshll.u32 %s1265_s23, 1 }
   0xf   : > { %s1139_s28 = scalar_lea.vmem %s1258_s4, %s881_s25 }
  0x10   : > { %s1144_s6 = scalar_lea.vmem %s1254_s0, %s957_s24 }
  0x12   : > { %v288_v0 = vld [vmem:[%s1255_s1] sm:$0xf]  ;;  %vm289_vm0 = vcmask 257024  }
  0x13   : > { %290 = vst.msk [vmem:[#allocation2] sm:$0xf] %vm289_vm0, %v288_v0 }
  0x14 PF: > { %v952_v1 = vld [vmem:[%s1256_s2 + $0x8] sm:$0xff]  ;;  %v954_v2 = vld [vmem:[%s1256_s2 + $0x18] sm:$0xff]  ;;  %v951_v3 = vld [vmem:[%s1256_s2] sm:$0xff]  ;;  %vm323_vm1 = vcmask 261120   ;;  %vm444_vm10 = vcmask 254976   ;;  %s1086_s27 = smov [#allocation3]  }
  0x15   : > { %v1161_v4 = vld [vmem:[%s1256_s2 + $0x28] sm:$0xff]  ;;  %333 = vmatpush.bf16.msra.mxu0 %v952_v1  ;;  %358 = vmatpush.bf16.msra.mxu1 %v954_v2  ;;  %v953_v5 = vld [vmem:[%s1256_s2 + $0x10] sm:$0xff]  ;;  %v1172_v7 = vld [vmem:[%s1256_s2 + $0x20] sm:$0xff]  ;;  %s766_s29 = sshll.u32 %s1086_s27, 4  ;;  %s768_s7 = sshll.u32 %s1259_s5, 4  ;;  %s767_s29 = int_to_ptr.vmem [resolvable:$true] %s766_s29  ;;  %s769_s7 = int_to_ptr.hbm [resolvable:$true] %s768_s7 }
  0x16   : > { %429 = vmatpush.bf16.msra.mxu2 %v1161_v4  ;;  %459 = vmatpush.bf16.msra.mxu3 %v952_v1  ;;  %v307_v9 = vld [vmem:[%s1144_s6] sm:$0x3]  ;;  %v308_v10 = vld [vmem:[%s1144_s6 + $0x2] sm:$0x3]  ;;  %v309_v38 = vld [vmem:[%s1144_s6 + $0x4] sm:$0x3] }
  0x17   : > { %v365_v11 = vunpack.c.l.bf16 %v307_v9  ;;  %v386_v12 = vunpack.c.l.bf16 %v308_v10  ;;  %v1189_v32 = vld [vmem:[%s1257_s3] ss:$0 sm:$0xff]  ;;  %v407_v43 = vunpack.c.l.bf16 %v309_v38  ;;  %v921_v59 = vld [vmem:[%s1144_s6 + $0x8] sm:$0x3]  ;;  %v920_v62 = vld [vmem:[%s1144_s6 + $0x6] sm:$0x3] }
  0x18   : > { %v500_v60 = vunpack.c.l.bf16 %v921_v59  ;;  %p962_p6 = scmp.eq.s32.totalorder %s872_s21, 1 }
  0x19   : > { %334 = vmatpush.bf16.msra.mxu0 %v951_v3  ;;  %359 = vmatpush.bf16.msra.mxu1 %v953_v5 }
  0x1a   : > { %v1166_v6 = vld [vmem:[#allocation2] sm:$0xf]  ;;  %430 = vmatpush.bf16.msra.mxu2 %v1172_v7  ;;  %460 = vmatpush.bf16.msra.mxu3 %v951_v3 }
  0x1b   : > { %v310_v8 = vpack.c.bf16 %v1166_v6, %v1166_v6 }
  0x1d   : > { %472 = vmatpush.bf16.msrb.mxu0 %v954_v2  ;;  %528 = vmatpush.bf16.msrb.mxu1 %v1161_v4 }
  0x1e   : > { %899 = vmatmul.msk.bf16.vlgmr.msra.gmra.mxu0 %vm323_vm1, %v310_v8  ;;  %908 = vmatmul.msk.bf16.vlgmr.msra.gmra.mxu1 %vm323_vm1, %v310_v8 }
  0x1f   : > { %919 = vmatmul.msk.bf16.vlgmr.msra.gmra.mxu2 %vm323_vm1, %v310_v8  ;;  %571 = vmatpush.bf16.msrb.mxu3 %v954_v2 }
  0x20   : > { %558 = vmatpush.bf16.msrb.mxu2 %v952_v1 }
  0x21   : > { %473 = vmatpush.bf16.msrb.mxu0 %v953_v5  ;;  %529 = vmatpush.bf16.msrb.mxu1 %v1172_v7 }
  0x23   : > { %572 = vmatpush.bf16.msrb.mxu3 %v953_v5 }
  0x24   : > { %559 = vmatpush.bf16.msrb.mxu2 %v951_v3 }
  0x25   : > { %627 = vmatpush.bf16.msra.mxu0 %v1161_v4  ;;  %657 = vmatpush.bf16.msra.mxu1 %v952_v1 }
  0x28   : > { %670 = vmatpush.bf16.msra.mxu2 %v954_v2  ;;  %v479_v2 = vunpack.c.l.bf16 %v920_v62 }
  0x29   : > { %628 = vmatpush.bf16.msra.mxu0 %v1172_v7  ;;  %658 = vmatpush.bf16.msra.mxu1 %v951_v3 }
  0x2c   : > { %671 = vmatpush.bf16.msra.mxu2 %v953_v5 }
  0x9b   : > { %v336_v13 = vpop.f32.mrf.mxu0  ;;  %v361_v14 = vpop.f32.mrf.mxu1 }
  0x9c   : > { %v366_v15 = vadd.f32 %v365_v11, %v336_v13  ;;  %v387_v16 = vadd.f32 %v386_v12, %v361_v14 }
  0x9e   : > { %v909_v17 = vmul.f32 -1.442695, %v366_v15  ;;  %v910_v18 = vmul.f32 -1.442695, %v387_v16 }
  0xa0   : > { %990 = vpow2.f32 %v909_v17 }
  0xa1   : > { %992 = vpow2.f32 %v910_v18 }
  0xa2   : > { %v432_v19 = vpop.f32.mrf.mxu2 }
  0xa3   : > { %v338_v20 = vpop.f32.mrf.mxu0  ;;  %v363_v21 = vpop.f32.mrf.mxu1  ;;  %v433_v40 = vadd.f32 %v1189_v32, %v432_v19 }
  0xa6   : > { %v991_v22 = vpop.eup %990 }
  0xa7   : > { %v993_v23 = vpop.eup %992  ;;  %v370_v24 = vadd.f32 1.0, %v991_v22 }
  0xa8   : > { %v391_v25 = vadd.f32 1.0, %v993_v23  ;;  %v922_v23 = vld [vmem:[%s1144_s6 + $0xa] sm:$0x3] }
  0xa9   : > { %994 = vrcp.f32 %v370_v24  ;;  %v382_v34 = vand.u32 2147483648, %v370_v24  ;;  %v380_v36 = vand.u32 2147483647, %v370_v24  ;;  %vm376_vm3 = vweird.f32 %v370_v24 }
  0xaa   : > { %996 = vrcp.f32 %v391_v25  ;;  %v434_v26 = vpop.f32.mrf.mxu2  ;;  %vm397_vm6 = vweird.f32 %v391_v25  ;;  %v403_v46 = vand.u32 2147483648, %v391_v25  ;;  %v401_v48 = vand.u32 2147483647, %v391_v25 }
  0xab   : > { %v383_v41 = vor.u32 1.1754944e-38, %v382_v34  ;;  %vm381_vm5 = vcmp.eq.f32.partialorder %v380_v36, 8.507059e+37 }
  0xac   : > { %v404_v51 = vor.u32 1.1754944e-38, %v403_v46  ;;  %vm402_vm9 = vcmp.eq.f32.partialorder %v401_v48, 8.507059e+37  ;;  %v930_v46 = vld [vmem:[%s1144_s6 + $0xe] sm:$0x3] }
  0xaf   : > { %v995_v27 = vpop.eup %994 }
  0xb0   : > { %v997_v28 = vpop.eup %996  ;;  %v372_v29 = vmul.f32 %v995_v27, %v370_v24  ;;  %vm377_vm2 = vweird.f32 %v995_v27 }
  0xb1   : > { %v393_v30 = vmul.f32 %v997_v28, %v391_v25  ;;  %vm378_vm4 = vmor %vm376_vm3, %vm377_vm2  ;;  %vm398_vm7 = vweird.f32 %v997_v28 }
  0xb2   : > { %v373_v31 = vsub.f32 1.0, %v372_v29  ;;  %vm399_vm8 = vmor %vm397_vm6, %vm398_vm7 }
  0xb3   : > { %v394_v33 = vsub.f32 1.0, %v393_v30 }
  0xb4   : > { %v374_v35 = vmul.f32 %v995_v27, %v373_v31 }
  0xb5   : > { %v395_v37 = vmul.f32 %v997_v28, %v394_v33 }
  0xb6   : > { %v375_v39 = vadd.f32 %v995_v27, %v374_v35 }
  0xb7   : > { %v396_v45 = vadd.f32 %v997_v28, %v395_v37 }
  0xb8   : > { %v379_v42 = vsel %vm378_vm4, %v995_v27, %v375_v39 }
  0xb9   : > { %v384_v44 = vsel %vm381_vm5, %v383_v41, %v379_v42  ;;  %v400_v50 = vsel %vm399_vm8, %v997_v28, %v396_v45  ;;  %v521_v28 = vunpack.c.l.bf16 %v922_v23  ;;  %v929_v45 = vld [vmem:[%s1144_s6 + $0xc] sm:$0x3] }
  0xba   : > { %v436_v47 = vmul.f32 %v433_v40, %v384_v44  ;;  %v405_v52 = vsel %vm402_vm9, %v404_v51, %v400_v50  ;;  %v578_v48 = vunpack.c.l.bf16 %v929_v45 }
  0xbb   : > { %v439_v53 = vsub.f32 1.0, %v405_v52  ;;  %v441_v56 = vmul.f32 %v405_v52, %v1166_v6 }
  0xbc   : > { %v437_v49 = vadd.f32 %v436_v47, %v407_v43 }
  0xbe   : > { %998 = vtanh.f32 %v437_v49  ;;  %v599_v49 = vunpack.c.l.bf16 %v930_v46 }
  0xc4   : > { %v999_v54 = vpop.eup %998 }
  0xc5   : > { %v440_v55 = vmul.f32 %v999_v54, %v439_v53 }
  0xc7   : > { %v1194_v57 = vadd.f32 %v441_v56, %v440_v55 }
  0xc9   : > { %v443_v58 = vpack.c.bf16 %v1194_v57, %v1194_v57 }
  0xcb   : > { %445 = vst.msk [vmem:[%s1139_s28] sm:$0x3] %vm444_vm10, %v443_v58  ;;  %923 = vmatmul.msk.bf16.vlgmr.msra.gmra.mxu3 %vm323_vm1, %v443_v58  ;;  %924 = vmatmul.msk.bf16.vlgmr.msrb.gmra.mxu0 %vm323_vm1, %v443_v58 }
  0xcc   : > { %927 = vmatmul.msk.bf16.vlgmr.msrb.gmra.mxu1 %vm323_vm1, %v443_v58  ;;  %726 = vmatpush.bf16.msra.mxu3 %v1161_v4 }
  0xd0   : > { %727 = vmatpush.bf16.msra.mxu3 %v1172_v7 }
 0x148   : > { %v475_v61 = vpop.f32.mrf.mxu0 }
 0x149   : > { %v501_v63 = vadd.f32 %v500_v60, %v475_v61  ;;  %v531_v0 = vpop.f32.mrf.mxu1 }
 0x14a   : > { %v532_v26 = vadd.f32 %v1189_v32, %v531_v0 }
 0x14b   : > { %v926_v1 = vmul.f32 -1.442695, %v501_v63 }
 0x14d   : > { %1000 = vpow2.f32 %v926_v1 }
 0x14e   : > { %v462_v3 = vpop.f32.mrf.mxu3 }
 0x14f   : > { %v480_v5 = vadd.f32 %v479_v2, %v462_v3 }
 0x150   : > { %v477_v6 = vpop.f32.mrf.mxu0 }
 0x151   : > { %v925_v8 = vmul.f32 -1.442695, %v480_v5  ;;  %v533_v9 = vpop.f32.mrf.mxu1 }
 0x153   : > { %v1001_v10 = vpop.eup %1000  ;;  %1002 = vpow2.f32 %v925_v8 }
 0x154   : > { %v505_v11 = vadd.f32 1.0, %v1001_v10  ;;  %v931_v10 = vld [vmem:[%s1144_s6 + $0x10] sm:$0x3] }
 0x156   : > { %v464_v4 = vpop.f32.mrf.mxu3  ;;  %1004 = vrcp.f32 %v505_v11  ;;  %v517_v31 = vand.u32 2147483648, %v505_v11  ;;  %vm511_vm0 = vweird.f32 %v505_v11  ;;  %v515_v34 = vand.u32 2147483647, %v505_v11 }
 0x158   : > { %v518_v37 = vor.u32 1.1754944e-38, %v517_v31  ;;  %vm516_vm3 = vcmp.eq.f32.partialorder %v515_v34, 8.507059e+37  ;;  %v939_v34 = vld [vmem:[%s1144_s6 + $0x14] sm:$0x3] }
 0x159   : > { %v1003_v7 = vpop.eup %1002 }
 0x15a   : > { %v484_v12 = vadd.f32 1.0, %v1003_v7 }
 0x15c   : > { %1006 = vrcp.f32 %v484_v12  ;;  %v1005_v13 = vpop.eup %1004  ;;  %v496_v19 = vand.u32 2147483648, %v484_v12  ;;  %v494_v21 = vand.u32 2147483647, %v484_v12  ;;  %vm490_vm12 = vweird.f32 %v484_v12 }
 0x15d   : > { %v507_v14 = vmul.f32 %v1005_v13, %v505_v11  ;;  %vm512_vm15 = vweird.f32 %v1005_v13 }
 0x15e   : > { %v497_v25 = vor.u32 1.1754944e-38, %v496_v19  ;;  %vm495_vm14 = vcmp.eq.f32.partialorder %v494_v21, 8.507059e+37  ;;  %vm513_vm2 = vmor %vm511_vm0, %vm512_vm15 }
 0x15f   : > { %v508_v17 = vsub.f32 1.0, %v507_v14  ;;  %v620_v14 = vunpack.c.l.bf16 %v931_v10 }
 0x161   : > { %v509_v22 = vmul.f32 %v1005_v13, %v508_v17 }
 0x162   : > { %v1007_v15 = vpop.eup %1006 }
 0x163   : > { %v486_v16 = vmul.f32 %v1007_v15, %v484_v12  ;;  %vm491_vm11 = vweird.f32 %v1007_v15  ;;  %v510_v30 = vadd.f32 %v1005_v13, %v509_v22 }
 0x164   : > { %vm492_vm13 = vmor %vm490_vm12, %vm491_vm11 }
 0x165   : > { %v487_v18 = vsub.f32 1.0, %v486_v16  ;;  %v514_v36 = vsel %vm513_vm2, %v1005_v13, %v510_v30  ;;  %v938_v30 = vld [vmem:[%s1144_s6 + $0x12] sm:$0x3] }
 0x166   : > { %v519_v38 = vsel %vm516_vm3, %v518_v37, %v514_v36  ;;  %v677_v31 = vunpack.c.l.bf16 %v938_v30  ;;  %v698_v37 = vunpack.c.l.bf16 %v939_v34 }
 0x167   : > { %v488_v20 = vmul.f32 %v1007_v15, %v487_v18  ;;  %v538_v39 = vsub.f32 1.0, %v519_v38  ;;  %v540_v42 = vmul.f32 %v519_v38, %v1194_v57 }
 0x169   : > { %v489_v24 = vadd.f32 %v1007_v15, %v488_v20 }
 0x16b   : > { %v493_v27 = vsel %vm492_vm13, %v1007_v15, %v489_v24 }
 0x16c   : > { %v498_v29 = vsel %vm495_vm14, %v497_v25, %v493_v27 }
 0x16d   : > { %v535_v33 = vmul.f32 %v532_v26, %v498_v29 }
 0x16f   : > { %v536_v35 = vadd.f32 %v535_v33, %v521_v28 }
 0x171   : > { %1008 = vtanh.f32 %v536_v35 }
 0x177   : > { %v1009_v40 = vpop.eup %1008 }
 0x178   : > { %v539_v41 = vmul.f32 %v1009_v40, %v538_v39 }
 0x17a   : > { %v1210_v43 = vadd.f32 %v540_v42, %v539_v41 }
 0x17c   : > { %v542_v44 = vpack.c.bf16 %v1210_v43, %v1210_v43 }
 0x17e   : > { %928 = vst.msk [vmem:[%s1139_s28 + $0x2] sm:$0x3] %vm444_vm10, %v542_v44  ;;  %932 = vmatmul.msk.bf16.vlgmr.msrb.gmra.mxu2 %vm323_vm1, %v542_v44  ;;  %933 = vmatmul.msk.bf16.vlgmr.msrb.gmra.mxu3 %vm323_vm1, %v542_v44 }
 0x17f   : > { %936 = vmatmul.msk.bf16.vlgmr.msra.gmra.mxu0 %vm323_vm1, %v542_v44 }
 0x1fc   : > { %v630_v47 = vpop.f32.mrf.mxu0 }
 0x1fd   : > { %v631_v12 = vadd.f32 %v1189_v32, %v630_v47 }
 0x201   : > { %v561_v50 = vpop.f32.mrf.mxu2  ;;  %v574_v51 = vpop.f32.mrf.mxu3 }
 0x202   : > { %v579_v52 = vadd.f32 %v578_v48, %v561_v50  ;;  %v600_v53 = vadd.f32 %v599_v49, %v574_v51 }
 0x204   : > { %v934_v54 = vmul.f32 -1.442695, %v579_v52  ;;  %v935_v55 = vmul.f32 -1.442695, %v600_v53  ;;  %v632_v56 = vpop.f32.mrf.mxu0  ;;  %v940_v53 = vld [vmem:[%s1144_s6 + $0x16] sm:$0x3] }
 0x206   : > { %1010 = vpow2.f32 %v934_v54 }
 0x207   : > { %1012 = vpow2.f32 %v935_v55 }
 0x209   : > { %v563_v57 = vpop.f32.mrf.mxu2  ;;  %v576_v58 = vpop.f32.mrf.mxu3 }
 0x20c   : > { %v1011_v59 = vpop.eup %1010 }
 0x20d   : > { %v1013_v60 = vpop.eup %1012  ;;  %v583_v61 = vadd.f32 1.0, %v1011_v59 }
 0x20e   : > { %v604_v62 = vadd.f32 1.0, %v1013_v60  ;;  %v719_v60 = vunpack.c.l.bf16 %v940_v53 }
 0x20f   : > { %1014 = vrcp.f32 %v583_v61  ;;  %v595_v5 = vand.u32 2147483648, %v583_v61  ;;  %v593_v9 = vand.u32 2147483647, %v583_v61  ;;  %vm589_vm5 = vweird.f32 %v583_v61 }
 0x210   : > { %1016 = vrcp.f32 %v604_v62  ;;  %v616_v18 = vand.u32 2147483648, %v604_v62  ;;  %vm610_vm9 = vweird.f32 %v604_v62  ;;  %v614_v19 = vand.u32 2147483647, %v604_v62 }
 0x211   : > { %v596_v7 = vor.u32 1.1754944e-38, %v595_v5  ;;  %vm594_vm7 = vcmp.eq.f32.partialorder %v593_v9, 8.507059e+37 }
 0x212   : > { %v617_v22 = vor.u32 1.1754944e-38, %v616_v18  ;;  %vm615_vm12 = vcmp.eq.f32.partialorder %v614_v19, 8.507059e+37 }
 0x215   : > { %v1015_v63 = vpop.eup %1014 }
 0x216   : > { %v1017_v0 = vpop.eup %1016  ;;  %v585_v1 = vmul.f32 %v1015_v63, %v583_v61  ;;  %vm590_vm4 = vweird.f32 %v1015_v63 }
 0x217   : > { %v606_v2 = vmul.f32 %v1017_v0, %v604_v62  ;;  %vm591_vm6 = vmor %vm589_vm5, %vm590_vm4  ;;  %vm611_vm8 = vweird.f32 %v1017_v0  ;;  %vm743_vm5 = vcmask 257024  }
 0x218   : > { %v586_v3 = vsub.f32 1.0, %v585_v1  ;;  %vm612_vm11 = vmor %vm610_vm9, %vm611_vm8 }
 0x219   : > { %v607_v6 = vsub.f32 1.0, %v606_v2 }
 0x21a   : > { %v587_v8 = vmul.f32 %v1015_v63, %v586_v3 }
 0x21b   : > { %v608_v11 = vmul.f32 %v1017_v0, %v607_v6 }
 0x21c   : > { %v588_v4 = vadd.f32 %v1015_v63, %v587_v8 }
 0x21d   : > { %v609_v16 = vadd.f32 %v1017_v0, %v608_v11 }
 0x21e   : > { %v592_v13 = vsel %vm591_vm6, %v1015_v63, %v588_v4 }
 0x21f   : > { %v597_v15 = vsel %vm594_vm7, %v596_v7, %v592_v13  ;;  %v613_v21 = vsel %vm612_vm11, %v1017_v0, %v609_v16 }
 0x220   : > { %v634_v17 = vmul.f32 %v631_v12, %v597_v15  ;;  %v618_v23 = vsel %vm615_vm12, %v617_v22, %v613_v21 }
 0x221   : > { %v637_v24 = vsub.f32 1.0, %v618_v23  ;;  %v639_v27 = vmul.f32 %v618_v23, %v1210_v43 }
 0x222   : > { %v635_v20 = vadd.f32 %v634_v17, %v620_v14 }
 0x224   : > { %1018 = vtanh.f32 %v635_v20 }
 0x22a   : > { %v1019_v25 = vpop.eup %1018 }
 0x22b   : > { %v638_v26 = vmul.f32 %v1019_v25, %v637_v24 }
 0x22d   : > { %v1224_v28 = vadd.f32 %v639_v27, %v638_v26 }
 0x22f   : > { %v641_v29 = vpack.c.bf16 %v1224_v28, %v1224_v28 }
 0x231   : > { %941 = vmatmul.msk.bf16.vlgmr.msra.gmra.mxu1 %vm323_vm1, %v641_v29  ;;  %937 = vst.msk [vmem:[%s1139_s28 + $0x4] sm:$0x3] %vm444_vm10, %v641_v29  ;;  %942 = vmatmul.msk.bf16.vlgmr.msra.gmra.mxu2 %vm323_vm1, %v641_v29 }
 0x232   : > { %945 = vmatmul.msk.bf16.vlgmr.msra.gmra.mxu3 %vm323_vm1, %v641_v29 }
 0x2ae   : > { %v660_v33 = vpop.f32.mrf.mxu1 }
 0x2af   : > { %v678_v35 = vadd.f32 %v677_v31, %v660_v33 }
 0x2b1   : > { %v943_v36 = vmul.f32 -1.442695, %v678_v35 }
 0x2b3   : > { %1020 = vpow2.f32 %v943_v36 }
 0x2b4   : > { %v673_v38 = vpop.f32.mrf.mxu2 }
 0x2b5   : > { %v699_v39 = vadd.f32 %v698_v37, %v673_v38  ;;  %v729_v40 = vpop.f32.mrf.mxu3 }
 0x2b6   : > { %v662_v41 = vpop.f32.mrf.mxu1  ;;  %v730_v63 = vadd.f32 %v1189_v32, %v729_v40 }
 0x2b7   : > { %v944_v42 = vmul.f32 -1.442695, %v699_v39 }
 0x2b9   : > { %v1021_v43 = vpop.eup %1020  ;;  %1022 = vpow2.f32 %v944_v42 }
 0x2ba   : > { %v682_v44 = vadd.f32 1.0, %v1021_v43 }
 0x2bc   : > { %1024 = vrcp.f32 %v682_v44  ;;  %v675_v45 = vpop.f32.mrf.mxu2  ;;  %v694_v52 = vand.u32 2147483648, %v682_v44  ;;  %v692_v55 = vand.u32 2147483647, %v682_v44  ;;  %vm688_vm13 = vweird.f32 %v682_v44 }
 0x2bd   : > { %v731_v46 = vpop.f32.mrf.mxu3 }
 0x2be   : > { %v695_v59 = vor.u32 1.1754944e-38, %v694_v52  ;;  %vm693_vm15 = vcmp.eq.f32.partialorder %v692_v55, 8.507059e+37 }
 0x2bf   : > { %v1023_v47 = vpop.eup %1022 }
 0x2c0   : > { %v703_v48 = vadd.f32 1.0, %v1023_v47 }
 0x2c2   : > { %v1025_v49 = vpop.eup %1024  ;;  %1026 = vrcp.f32 %v703_v48  ;;  %v715_v2 = vand.u32 2147483648, %v703_v48  ;;  %v713_v5 = vand.u32 2147483647, %v703_v48  ;;  %vm709_vm2 = vweird.f32 %v703_v48 }
 0x2c3   : > { %v684_v50 = vmul.f32 %v1025_v49, %v682_v44  ;;  %vm689_vm1 = vweird.f32 %v1025_v49 }
 0x2c4   : > { %vm690_vm14 = vmor %vm688_vm13, %vm689_vm1  ;;  %v716_v10 = vor.u32 1.1754944e-38, %v715_v2  ;;  %vm714_vm4 = vcmp.eq.f32.partialorder %v713_v5, 8.507059e+37 }
 0x2c5   : > { %v685_v51 = vsub.f32 1.0, %v684_v50 }
 0x2c7   : > { %v686_v54 = vmul.f32 %v1025_v49, %v685_v51 }
 0x2c8   : > { %v1027_v56 = vpop.eup %1026 }
 0x2c9   : > { %v705_v57 = vmul.f32 %v1027_v56, %v703_v48  ;;  %v687_v58 = vadd.f32 %v1025_v49, %v686_v54  ;;  %vm710_vm0 = vweird.f32 %v1027_v56 }
 0x2ca   : > { %vm711_vm3 = vmor %vm709_vm2, %vm710_vm0 }
 0x2cb   : > { %v706_v61 = vsub.f32 1.0, %v705_v57  ;;  %v691_v62 = vsel %vm690_vm14, %v1025_v49, %v687_v58 }
 0x2cc   : > { %v696_v0 = vsel %vm693_vm15, %v695_v59, %v691_v62 }
 0x2cd   : > { %v707_v1 = vmul.f32 %v1027_v56, %v706_v61  ;;  %v733_v3 = vmul.f32 %v730_v63, %v696_v0 }
 0x2cf   : > { %v734_v6 = vadd.f32 %v733_v3, %v719_v60  ;;  %v708_v8 = vadd.f32 %v1027_v56, %v707_v1 }
 0x2d1   : > { %1028 = vtanh.f32 %v734_v6  ;;  %v712_v9 = vsel %vm711_vm3, %v1027_v56, %v708_v8 }
 0x2d2   : > { %v717_v11 = vsel %vm714_vm4, %v716_v10, %v712_v9 }
 0x2d3   : > { %v736_v4 = vsub.f32 1.0, %v717_v11  ;;  %v738_v12 = vmul.f32 %v717_v11, %v1224_v28 }
 0x2d7   : > { %v1029_v7 = vpop.eup %1028 }
 0x2d8   : > { %v737_v32 = vmul.f32 %v1029_v7, %v736_v4 }
 0x2da   : > { %v739_v13 = vadd.f32 %v738_v12, %v737_v32 }
 0x2dc   : > { %v740_v14 = vpack.c.bf16 %v739_v13, %v739_v13  ;;  %744 = vst.msk [vmem:[#allocation2] sm:$0xf] %vm743_vm5, %v739_v13 }
 0x2dd   : > { %745 = vst.msk [vmem:[#allocation3] sm:$0xf] %vm743_vm5, %v739_v13 }
 0x2de   : > { %946 = vst.msk [vmem:[%s1139_s28 + $0x6] sm:$0x3] %vm444_vm10, %v740_v14  ;;  %959 = dma.vmem_to_hbm [thread:$0]  (%p962_p6), %s767_s29, 64, %s769_s7, [#allocation4]  }
 0x2df   : > { %1071 = dma.done.wait (%p962_p6), [#allocation4], 64  }
 0x2e0   : > { %1073 = vsyncadd (%p962_p6), [#allocation4], 4294967232 }
 0x2e1 PF: > { %s17_s20 = sadd.s32 1, %s1084_s20   ;;  %s1260_s18 = smov %s1080_s19 }
 0x2e2   : > { %p14_p7 = scmp.ge.s32.totalorder %s17_s20, 4   ;;  %s1261_s19 = smov %s1263_s22 }
 0x2e4   :  { %16 = sbr.rel (!%p14_p7) target bundleno = 2 (0x2), region = 91 }
 0x2e9   :  { %793 = vsyncpa [#allocation4], 1 }
 0x2ea   :  { %795 = vsyncpa [#allocation4 + $0x1], 1 }

</bundles_post_ra>
